<compile_context>
chip_gen: v7x
topology: tpu7x:2x2x1
jax: 0.10.0
libtpu: 0.0.40
codegen_flags: <defaults>
</compile_context>

<pallas_src>
import functools

import jax
import jax.numpy as jnp
import numpy as np
from jax.experimental import pallas as pl
from jax.experimental.pallas import tpu as pltpu


def _round_up(x, m):
    return (x + m - 1) // m * m


# ----------------------------------------------------------------------------
# Pallas kernel: entire GCNModel forward, fully fused, single grid step.
# ----------------------------------------------------------------------------
def _fused_gcn_forward_kernel(*refs, n_layers, f_out_pad):
    # refs = (adj, x, wcat_0..wcat_{L-1}, shifts, out)
    #   adj    : (N, N)                  bf16  normalized adjacency
    #   x      : (N, F0_pad)             bf16  zero-padded node features
    #   wcat_i : (F_in_pad, 2*Fop)       bf16  [W*scale | Wself*scale]
    #   shifts : (L, Fop)                f32   folded conv-bias + BN shift
    #   out    : (N, Fop)                f32   log-probs (padded lanes ~ -1e30)
    adj = refs[0][...]
    x = refs[1][...]
    shifts = refs[2 + n_layers][...]
    out_ref = refs[3 + n_layers]

    for li in range(n_layers):
        wcat = refs[2 + li][...]

        # One wide MXU matmul produces both the neighbour "support" term
        # (x @ W*s) and the self-loop term (x @ Wself*s).  f32 accumulation.
        support2 = jnp.dot(x, wcat, preferred_element_type=jnp.float32)
        support = support2[:, :f_out_pad]          # lane-aligned slice
        loop = support2[:, f_out_pad:]

        agg = jnp.dot(adj, support.astype(jnp.bfloat16),
                      preferred_element_type=jnp.float32)

        # BN scale is pre-folded into the weights; only the shift remains.
        h = agg + loop + shifts[li:li + 1, :]

        if li < n_layers - 1:
            h = jnp.maximum(h, 0.0)                # ReLU (hidden layers)
            x = h.astype(jnp.bfloat16)             # feed next layer's matmul
        else:
            # F.log_softmax(dim=1); padded lanes carry shift = -1e30 so their
            # exp underflows to 0 and the normalizer is exact.
            m = jnp.max(h, axis=-1, keepdims=True)
            h = h - m
            h = h - jnp.log(jnp.sum(jnp.exp(h), axis=-1, keepdims=True))
            out_ref[...] = h


# ----------------------------------------------------------------------------
# Parameter preparation: pad to lane-dense shapes, fold bias + BatchNorm.
# Shared by the kernel wrapper and the matched-precision reference.
# ----------------------------------------------------------------------------
def _prepare_params(params_list, nfeat, *, lane=128, matmul_dtype=jnp.bfloat16):
    n_layers = len(params_list)
    f_in0_pad = _round_up(nfeat, lane)
    f_out_pad = lane * max(pl.cdiv(int(p["w"].shape[1]), lane) for p in params_list)

    wcats, shifts = [], []
    f_in_pad = f_in0_pad
    for li, p in enumerate(params_list):
        f_in, f_out = p["w"].shape

        # Fold conv bias + BatchNorm1d (eval) into an affine (scale, shift):
        #   BN(h + b) = (h + b - mean) * gamma / sqrt(var + eps) + beta
        # scale is per-output-column, so it commutes with the adjacency matmul
        # and can be folded straight into W / Wself (in f32, before bf16 cast).
        inv = 1.0 / jnp.sqrt(p["bn_var"] + 1e-5)
        scale = p["bn_gamma"] * inv
        shift = (p["bias"] - p["bn_mean"]) * scale + p["bn_beta"]

        wcat = jnp.zeros((f_in_pad, 2 * f_out_pad), jnp.float32)
        wcat = wcat.at[:f_in, :f_out].set(p["w"] * scale[None, :])
        wcat = wcat.at[:f_in, f_out_pad:f_out_pad + f_out].set(
            p["wself"] * scale[None, :])
        wcats.append(wcat.astype(matmul_dtype))

        # Hidden layers: padded lanes get 0 (ReLU(0)=0; zero weight rows in the
        # next layer ignore them).  Output layer: padded lanes get -1e30 so
        # log_softmax ignores them; they are sliced off in the wrapper.
        pad_fill = 0.0 if li < n_layers - 1 else -1e30
        shifts.append(jnp.full((f_out_pad,), pad_fill, jnp.float32)
                      .at[:f_out].set(shift))
        f_in_pad = f_out_pad

    return wcats, jnp.stack(shifts, axis=0), f_in0_pad, f_out_pad


# ----------------------------------------------------------------------------
# Wrapper: build the single fused pallas_call.
# ----------------------------------------------------------------------------
def gcn_model_forward(fea, adj, params_list, *, matmul_dtype=jnp.bfloat16,
                      lane=128):
    """inputlayer='gcn' -> nhidlayer x MultiLayerGCNBlock (GCN-BS layers) ->
    outputlayer 'gcn' -> log_softmax(dim=1), inference mode."""
    N, nfeat = fea.shape
    n_layers = len(params_list)
    nclass = params_list[-1]["w"].shape[1]
    assert N % 8 == 0

    wcats, shifts, f_in0_pad, f_out_pad = _prepare_params(
        params_list, nfeat, lane=lane, matmul_dtype=matmul_dtype)

    # Zero-pad input features to a lane multiple (zero columns x zero weight
    # rows -> no effect on the result).
    x_pad = jnp.zeros((N, f_in0_pad), jnp.float32).at[:, :nfeat].set(fea)

    inputs = [adj.astype(matmul_dtype), x_pad.astype(matmul_dtype)] + wcats + [shifts]
    in_specs = [
        pl.BlockSpec((N, N), lambda i: (0, 0)),
        pl.BlockSpec((N, f_in0_pad), lambda i: (0, 0)),
    ]
    for w in wcats:
        in_specs.append(pl.BlockSpec(tuple(w.shape), lambda i: (0, 0)))
    in_specs.append(pl.BlockSpec((n_layers, f_out_pad), lambda i: (0, 0)))

    kernel = functools.partial(_fused_gcn_forward_kernel,
                               n_layers=n_layers, f_out_pad=f_out_pad)

    out_pad = pl.pallas_call(
        kernel,
        out_shape=jax.ShapeDtypeStruct((N, f_out_pad), jnp.float32),
        grid_spec=pltpu.PrefetchScalarGridSpec(
            num_scalar_prefetch=0,
            grid=(1,),                               # whole problem in VMEM
            in_specs=in_specs,
            out_specs=pl.BlockSpec((N, f_out_pad), lambda i: (0, 0)),
        ),
        compiler_params=pltpu.CompilerParams(
            dimension_semantics=("arbitrary",)),
    )(*inputs)

    return out_pad[:, :nclass]


# ----------------------------------------------------------------------------
# Parameter construction (deterministic, mirrors GraphConvolutionBS.__init__)
# ----------------------------------------------------------------------------
def init_gcn_bs_params(key, f_in, f_out):
    k = jax.random.split(key, 5)
    stdv = 1.0 / np.sqrt(f_out)
    return {
        "w": jax.random.uniform(k[0], (f_in, f_out), jnp.float32, -stdv, stdv),
        "wself": jax.random.uniform(k[1], (f_in, f_out), jnp.float32, -stdv, stdv),
        "bias": jax.random.uniform(k[2], (f_out,), jnp.float32, -stdv, stdv),
        "bn_gamma": jax.random.uniform(k[3], (f_out,), jnp.float32, 0.9, 1.1),
        "bn_beta": jax.random.uniform(k[4], (f_out,), jnp.float32, -0.1, 0.1),
        "bn_mean": jnp.zeros((f_out,), jnp.float32),
        "bn_var": jnp.ones((f_out,), jnp.float32),
    }


# Pure-JAX reference with the SAME precision regime and parameter folding
# (bf16 operands, f32 accumulation, f32 epilogue) for a tight correctness
# check of the in-kernel arithmetic.
def _reference_forward(fea, adj, params_list, *, matmul_dtype=jnp.bfloat16,
                       lane=128):
    N, nfeat = fea.shape
    n_layers = len(params_list)
    nclass = params_list[-1]["w"].shape[1]
    wcats, shifts, f_in0_pad, f_out_pad = _prepare_params(
        params_list, nfeat, lane=lane, matmul_dtype=matmul_dtype)

    x = (jnp.zeros((N, f_in0_pad), jnp.float32).at[:, :nfeat].set(fea)
         ).astype(matmul_dtype)
    adj_c = adj.astype(matmul_dtype)
    h = None
    for li in range(n_layers):
        s2 = jnp.dot(x, wcats[li], preferred_element_type=jnp.float32)
        support = s2[:, :f_out_pad]
        loop = s2[:, f_out_pad:]
        agg = jnp.dot(adj_c, support.astype(matmul_dtype),
                      preferred_element_type=jnp.float32)
        h = agg + loop + shifts[li][None, :]
        if li < n_layers - 1:
            x = jnp.maximum(h, 0.0).astype(matmul_dtype)
        else:
            m = jnp.max(h, axis=-1, keepdims=True)
            h = h - m
            h = h - jnp.log(jnp.sum(jnp.exp(h), axis=-1, keepdims=True))
    return h[:, :nclass]


if __name__ == "__main__":
    # Small config: nfeat=64, nhid=64, nclass=16, nhidlayer=1, nbaselayer=1,
    # activation=ReLU, withbn=True, withloop=True, dropout (inference -> no-op).
    N, NFEAT, NHID, NCLASS = 256, 64, 64, 16
    NHIDLAYER, NBASELAYER = 1, 1

    key = jax.random.PRNGKey(0)
    k_fea, k_adj, k_par = jax.random.split(key, 3)

    fea = jax.random.normal(k_fea, (N, NFEAT), jnp.float32)

    # Dense symmetric-normalized adjacency with self loops (glue, plain JAX).
    a = (jax.random.uniform(k_adj, (N, N)) < 0.05).astype(jnp.float32)
    a = jnp.maximum(a, a.T) + jnp.eye(N, dtype=jnp.float32)
    deg_isqrt = 1.0 / jnp.sqrt(jnp.sum(a, axis=1))
    adj = a * deg_isqrt[:, None] * deg_isqrt[None, :]

    # Layers: ingc (nfeat->nhid), nhidlayer * nbaselayer mid GCN-BS (nhid->nhid),
    # outgc (nhid->nclass).
    dims = [(NFEAT, NHID)] + [(NHID, NHID)] * (NHIDLAYER * NBASELAYER) + [(NHID, NCLASS)]
    pkeys = jax.random.split(k_par, len(dims))
    params_list = [init_gcn_bs_params(pk, fi, fo) for pk, (fi, fo) in zip(pkeys, dims)]

    out = gcn_model_forward(fea, adj, params_list)
    out = jax.block_until_ready(out)

    ref = _reference_forward(fea, adj, params_list)
    np.testing.assert_allclose(np.asarray(out), np.asarray(ref), rtol=1e-3, atol=1e-3)
    assert out.shape == (N, NCLASS)

    print("KERNEL_OK")
</pallas_src>

<mosaic_0001>
module attributes {stable_mosaic.version = 11 : i64} {
  func.func @_fused_gcn_forward_kernel(%arg0: i32, %arg1: memref<256x256xbf16, #tpu.memory_space<vmem>>, %arg2: memref<256x128xbf16, #tpu.memory_space<vmem>>, %arg3: memref<128x256xbf16, #tpu.memory_space<vmem>>, %arg4: memref<128x256xbf16, #tpu.memory_space<vmem>>, %arg5: memref<128x256xbf16, #tpu.memory_space<vmem>>, %arg6: memref<3x128xf32, #tpu.memory_space<vmem>>, %arg7: memref<256x128xf32, #tpu.memory_space<vmem>>) attributes {dimension_semantics = [#tpu.dimension_semantics<arbitrary>], iteration_bounds = array<i64: 1>, scalar_prefetch = 0 : i64, scratch_operands = 0 : i64, tpu.core_type = #tpu.core_type<tc>, window_params = [{pipeline_mode = #tpu.pipeline_mode<synchronous>, transform_indices = @transform_0, window_bounds = array<i64: 256, 256>}, {pipeline_mode = #tpu.pipeline_mode<synchronous>, transform_indices = @transform_1, window_bounds = array<i64: 256, 128>}, {pipeline_mode = #tpu.pipeline_mode<synchronous>, transform_indices = @transform_2, window_bounds = array<i64: 128, 256>}, {pipeline_mode = #tpu.pipeline_mode<synchronous>, transform_indices = @transform_3, window_bounds = array<i64: 128, 256>}, {pipeline_mode = #tpu.pipeline_mode<synchronous>, transform_indices = @transform_4, window_bounds = array<i64: 128, 256>}, {pipeline_mode = #tpu.pipeline_mode<synchronous>, transform_indices = @transform_5, window_bounds = array<i64: 3, 128>}, {pipeline_mode = #tpu.pipeline_mode<synchronous>, transform_indices = @transform_6, window_bounds = array<i64: 256, 128>}]} {
    %c0 = arith.constant 0 : index
    %c0_0 = arith.constant 0 : index
    %0 = vector.load %arg1[%c0, %c0_0] : memref<256x256xbf16, #tpu.memory_space<vmem>>, vector<256x256xbf16>
    %c0_1 = arith.constant 0 : index
    %c0_2 = arith.constant 0 : index
    %1 = vector.load %arg2[%c0_1, %c0_2] : memref<256x128xbf16, #tpu.memory_space<vmem>>, vector<256x128xbf16>
    %c0_3 = arith.constant 0 : index
    %c0_4 = arith.constant 0 : index
    %2 = vector.load %arg6[%c0_3, %c0_4] : memref<3x128xf32, #tpu.memory_space<vmem>>, vector<3x128xf32>
    %c0_5 = arith.constant 0 : index
    %c0_6 = arith.constant 0 : index
    %3 = vector.load %arg3[%c0_5, %c0_6] : memref<128x256xbf16, #tpu.memory_space<vmem>>, vector<128x256xbf16>
    %cst = arith.constant dense<0.000000e+00> : vector<256x256xf32>
    %4 = tpu.matmul %1, %3, %cst {dimension_numbers = #tpu.dot_dimension_numbers<[1], [0], [0], [1], [0, 0, 1, 1], [], []>} : vector<256x128xbf16>, vector<128x256xbf16>, vector<256x256xf32> -> vector<256x256xf32>
    %5 = vector.extract_strided_slice %4 {offsets = [0, 0], sizes = [256, 128], strides = [1, 1]} : vector<256x256xf32> to vector<256x128xf32>
    %6 = vector.extract_strided_slice %4 {offsets = [0, 128], sizes = [256, 128], strides = [1, 1]} : vector<256x256xf32> to vector<256x128xf32>
    %7 = arith.truncf %5 : vector<256x128xf32> to vector<256x128xbf16>
    %cst_7 = arith.constant dense<0.000000e+00> : vector<256x128xf32>
    %8 = tpu.matmul %0, %7, %cst_7 {dimension_numbers = #tpu.dot_dimension_numbers<[1], [0], [0], [1], [0, 0, 1, 1], [], []>} : vector<256x256xbf16>, vector<256x128xbf16>, vector<256x128xf32> -> vector<256x128xf32>
    %9 = arith.addf %8, %6 : vector<256x128xf32>
    %10 = vector.extract_strided_slice %2 {offsets = [0, 0], sizes = [1, 128], strides = [1, 1]} : vector<3x128xf32> to vector<1x128xf32>
    %11 = vector.broadcast %10 : vector<1x128xf32> to vector<256x128xf32>
    %12 = arith.addf %9, %11 : vector<256x128xf32>
    %cst_8 = arith.constant 0.000000e+00 : f32
    %13 = vector.broadcast %cst_8 : f32 to vector<256x128xf32>
    %14 = arith.maximumf %12, %13 : vector<256x128xf32>
    %15 = arith.truncf %14 : vector<256x128xf32> to vector<256x128xbf16>
    %c0_9 = arith.constant 0 : index
    %c0_10 = arith.constant 0 : index
    %16 = vector.load %arg4[%c0_9, %c0_10] : memref<128x256xbf16, #tpu.memory_space<vmem>>, vector<128x256xbf16>
    %cst_11 = arith.constant dense<0.000000e+00> : vector<256x256xf32>
    %17 = tpu.matmul %15, %16, %cst_11 {dimension_numbers = #tpu.dot_dimension_numbers<[1], [0], [0], [1], [0, 0, 1, 1], [], []>} : vector<256x128xbf16>, vector<128x256xbf16>, vector<256x256xf32> -> vector<256x256xf32>
    %18 = vector.extract_strided_slice %17 {offsets = [0, 0], sizes = [256, 128], strides = [1, 1]} : vector<256x256xf32> to vector<256x128xf32>
    %19 = vector.extract_strided_slice %17 {offsets = [0, 128], sizes = [256, 128], strides = [1, 1]} : vector<256x256xf32> to vector<256x128xf32>
    %20 = arith.truncf %18 : vector<256x128xf32> to vector<256x128xbf16>
    %cst_12 = arith.constant dense<0.000000e+00> : vector<256x128xf32>
    %21 = tpu.matmul %0, %20, %cst_12 {dimension_numbers = #tpu.dot_dimension_numbers<[1], [0], [0], [1], [0, 0, 1, 1], [], []>} : vector<256x256xbf16>, vector<256x128xbf16>, vector<256x128xf32> -> vector<256x128xf32>
    %22 = arith.addf %21, %19 : vector<256x128xf32>
    %23 = vector.extract_strided_slice %2 {offsets = [1, 0], sizes = [1, 128], strides = [1, 1]} : vector<3x128xf32> to vector<1x128xf32>
    %24 = vector.broadcast %23 : vector<1x128xf32> to vector<256x128xf32>
    %25 = arith.addf %22, %24 : vector<256x128xf32>
    %cst_13 = arith.constant 0.000000e+00 : f32
    %26 = vector.broadcast %cst_13 : f32 to vector<256x128xf32>
    %27 = arith.maximumf %25, %26 : vector<256x128xf32>
    %28 = arith.truncf %27 : vector<256x128xf32> to vector<256x128xbf16>
    %c0_14 = arith.constant 0 : index
    %c0_15 = arith.constant 0 : index
    %29 = vector.load %arg5[%c0_14, %c0_15] : memref<128x256xbf16, #tpu.memory_space<vmem>>, vector<128x256xbf16>
    %cst_16 = arith.constant dense<0.000000e+00> : vector<256x256xf32>
    %30 = tpu.matmul %28, %29, %cst_16 {dimension_numbers = #tpu.dot_dimension_numbers<[1], [0], [0], [1], [0, 0, 1, 1], [], []>} : vector<256x128xbf16>, vector<128x256xbf16>, vector<256x256xf32> -> vector<256x256xf32>
    %31 = vector.extract_strided_slice %30 {offsets = [0, 0], sizes = [256, 128], strides = [1, 1]} : vector<256x256xf32> to vector<256x128xf32>
    %32 = vector.extract_strided_slice %30 {offsets = [0, 128], sizes = [256, 128], strides = [1, 1]} : vector<256x256xf32> to vector<256x128xf32>
    %33 = arith.truncf %31 : vector<256x128xf32> to vector<256x128xbf16>
    %cst_17 = arith.constant dense<0.000000e+00> : vector<256x128xf32>
    %34 = tpu.matmul %0, %33, %cst_17 {dimension_numbers = #tpu.dot_dimension_numbers<[1], [0], [0], [1], [0, 0, 1, 1], [], []>} : vector<256x256xbf16>, vector<256x128xbf16>, vector<256x128xf32> -> vector<256x128xf32>
    %35 = arith.addf %34, %32 : vector<256x128xf32>
    %36 = vector.extract_strided_slice %2 {offsets = [2, 0], sizes = [1, 128], strides = [1, 1]} : vector<3x128xf32> to vector<1x128xf32>
    %37 = vector.broadcast %36 : vector<1x128xf32> to vector<256x128xf32>
    %38 = arith.addf %35, %37 : vector<256x128xf32>
    %cst_18 = arith.constant dense<0xFF800000> : vector<256xf32>
    %39 = vector.multi_reduction <maximumf>, %38, %cst_18 [1] : vector<256x128xf32> to vector<256xf32>
    %40 = vector.shape_cast %39 : vector<256xf32> to vector<256x1xf32>
    %41 = vector.broadcast %40 : vector<256x1xf32> to vector<256x128xf32>
    %42 = arith.subf %38, %41 : vector<256x128xf32>
    %43 = math.exp %42 : vector<256x128xf32>
    %cst_19 = arith.constant dense<0.000000e+00> : vector<256xf32>
    %44 = vector.multi_reduction <add>, %43, %cst_19 [1] : vector<256x128xf32> to vector<256xf32>
    %45 = vector.shape_cast %44 : vector<256xf32> to vector<256x1xf32>
    %46 = math.log %45 : vector<256x1xf32>
    %47 = vector.broadcast %46 : vector<256x1xf32> to vector<256x128xf32>
    %48 = arith.subf %42, %47 : vector<256x128xf32>
    %c0_20 = arith.constant 0 : index
    %c0_21 = arith.constant 0 : index
    %49 = vector.load %arg7[%c0_20, %c0_21] : memref<256x128xf32, #tpu.memory_space<vmem>>, vector<256x128xf32>
    tpu.vector_store %arg7[%c0_20, %c0_21], %48 {strides = array<i32>} : memref<256x128xf32, #tpu.memory_space<vmem>>, vector<256x128xf32>,
    return
  }
  func.func @transform_0(%arg0: i32) -> (i32, i32) {
    %c0_i32 = arith.constant 0 : i32
    %c0_i32_0 = arith.constant 0 : i32
    %c0_i32_1 = arith.constant 0 : i32
    return %c0_i32, %c0_i32_0 : i32, i32
  }
  func.func @transform_1(%arg0: i32) -> (i32, i32) {
    %c0_i32 = arith.constant 0 : i32
    %c0_i32_0 = arith.constant 0 : i32
    %c0_i32_1 = arith.constant 0 : i32
    return %c0_i32, %c0_i32_0 : i32, i32
  }
  func.func @transform_2(%arg0: i32) -> (i32, i32) {
    %c0_i32 = arith.constant 0 : i32
    %c0_i32_0 = arith.constant 0 : i32
    %c0_i32_1 = arith.constant 0 : i32
    return %c0_i32, %c0_i32_0 : i32, i32
  }
  func.func @transform_3(%arg0: i32) -> (i32, i32) {
    %c0_i32 = arith.constant 0 : i32
    %c0_i32_0 = arith.constant 0 : i32
    %c0_i32_1 = arith.constant 0 : i32
    return %c0_i32, %c0_i32_0 : i32, i32
  }
  func.func @transform_4(%arg0: i32) -> (i32, i32) {
    %c0_i32 = arith.constant 0 : i32
    %c0_i32_0 = arith.constant 0 : i32
    %c0_i32_1 = arith.constant 0 : i32
    return %c0_i32, %c0_i32_0 : i32, i32
  }
  func.func @transform_5(%arg0: i32) -> (i32, i32) {
    %c0_i32 = arith.constant 0 : i32
    %c0_i32_0 = arith.constant 0 : i32
    %c0_i32_1 = arith.constant 0 : i32
    return %c0_i32, %c0_i32_0 : i32, i32
  }
  func.func @transform_6(%arg0: i32) -> (i32, i32) {
    %c0_i32 = arith.constant 0 : i32
    %c0_i32_0 = arith.constant 0 : i32
    %c0_i32_1 = arith.constant 0 : i32
    return %c0_i32, %c0_i32_0 : i32, i32
  }
}

</mosaic_0001>

<bundles_post_ra>
// kernel: tpu_custom_call.1
= control target key start
LH: loop header
LB: loop body
LE: loop exit
PB: predicated region body
PF: predicated region fallthrough
CT: control target
= control target key end

     0   :  { %11 = vsyncpa [#allocation3], 0  ;;  %s4255_s0 = inlined_call_operand.hbm [shape: bf16[256,256], index: 0, kind: input, shape index: {}]   ;;  %s4256_s1 = inlined_call_operand.hbm [shape: bf16[256,128], index: 1, kind: input, shape index: {}]   ;;  %s4257_s2 = inlined_call_operand.hbm [shape: bf16[128,256], index: 2, kind: input, shape index: {}]   ;;  %s4258_s3 = inlined_call_operand.hbm [shape: bf16[128,256], index: 3, kind: input, shape index: {}]   ;;  %s4259_s4 = inlined_call_operand.hbm [shape: bf16[128,256], index: 4, kind: input, shape index: {}]   ;;  %s4260_s5 = inlined_call_operand.vmem [shape: f32[3,128], index: 5, kind: input, shape index: {}]   ;;  %s4261_s6 = inlined_call_operand.hbm [shape: f32[256,128], index: 6, kind: output, shape index: {}]  }
   0x1   :  { %12 = vsyncpa [#allocation6], 0 }
   0x2   :  { %13 = vsyncpa [#allocation9], 0 }
   0x3   :  { %14 = vsyncpa [#allocation4], 0  ;;  %s3267_s21 = smov [#allocation5]   ;;  %s3127_s25 = scalar_lea.hbm %s4256_s1, 2048 }
   0x4   :  { %s32_s22 = sshll.u32 %s3267_s21, 4  ;;  %p3128_p0 = scmp.ne.s32.totalorder %s4256_s1, %s3127_s25  ;;  %s33_s22 = int_to_ptr.vmem [resolvable:$true] %s32_s22 }
   0x5   :  { %p3131_p1 = scmp.lt.u32.totalorder %s3127_s25, %s4256_s1 }
   0x7   :  { %p3133_p2 = pnand %p3131_p1, %p3128_p0 }
   0x9   :  { %3136 = shalt.err (!%p3133_p2)
}
   0xa   :  { %s3137_s30 = scalar_lea.vmem %s33_s22, 2048  ;;  %p3142_p4 = scmp.lt.s32.totalorder %s33_s22, %s33_s22 }
   0xb   :  { %p3138_p3 = scmp.ne.s32.totalorder %s33_s22, %s3137_s30  ;;  %p3143_p5 = scmp.lt.s32.totalorder %s3137_s30, %s3137_s30 }
   0xd   :  { %p3144_p6 = por %p3143_p5, %p3142_p4 }
   0xf   :  { %p3145_p7 = pnand %p3144_p6, %p3138_p3 }
  0x11   :  { %3148 = shalt.err (!%p3145_p7)
}
  0x12   :  { %s3268_s7 = smov 64   ;;  %s3269_s8 = smov 4  }
  0x13   :  { %38 = dma.hbm_to_vmem [thread:$0]  %s4256_s1, 2048, %s33_s22, [#allocation6], %s3268_s7, %s3268_s7, %s3269_s8  }
  0x14   :  { %s3270_s11 = smov [#allocation8]   ;;  %s3271_s13 = smov [#allocation2]  }
  0x15   :  { %s56_s12 = sshll.u32 %s3270_s11, 4  ;;  %s20_s14 = sshll.u32 %s3271_s13, 4  ;;  %s57_s12 = int_to_ptr.vmem [resolvable:$true] %s56_s12  ;;  %s21_s14 = int_to_ptr.vmem [resolvable:$true] %s20_s14 }
  0x16   :  { %s3149_s17 = scalar_lea.hbm %s4258_s3, 2048 }
  0x17   :  { %p3150_p8 = scmp.ne.s32.totalorder %s4258_s3, %s3149_s17  ;;  %p3153_p9 = scmp.lt.u32.totalorder %s3149_s17, %s4258_s3 }
  0x19   :  { %p3155_p10 = pnand %p3153_p9, %p3150_p8 }
  0x1b   :  { %3158 = shalt.err (!%p3155_p10)
}
  0x1c   :  { %s3159_s1 = scalar_lea.vmem %s57_s12, 2048  ;;  %p3164_p12 = scmp.lt.s32.totalorder %s57_s12, %s57_s12 }
  0x1d   :  { %p3160_p11 = scmp.ne.s32.totalorder %s57_s12, %s3159_s1  ;;  %p3165_p13 = scmp.lt.s32.totalorder %s3159_s1, %s3159_s1 }
  0x1f   :  { %p3166_p0 = por %p3165_p13, %p3164_p12 }
  0x21   :  { %p3167_p1 = pnand %p3166_p0, %p3160_p11 }
  0x23   :  { %3170 = shalt.err (!%p3167_p1)
}
  0x24   :  { %s3272_s22 = smov 128   ;;  %s3273_s23 = smov 8  }
  0x25   :  { %62 = dma.hbm_to_vmem [thread:$0]  %s4258_s3, 2048, %s57_s12, [#allocation9], %s3272_s22, %s3272_s22, %s3273_s23  }
  0x26   :  { %s3171_s28 = scalar_lea.hbm %s4255_s0, 4096 }
  0x27   :  { %p3172_p2 = scmp.ne.s32.totalorder %s4255_s0, %s3171_s28  ;;  %p3175_p3 = scmp.lt.u32.totalorder %s3171_s28, %s4255_s0 }
  0x29   :  { %p3177_p4 = pnand %p3175_p3, %p3172_p2 }
  0x2b   :  { %3180 = shalt.err (!%p3177_p4)
}
  0x2c   :  { %s3181_s9 = scalar_lea.vmem %s21_s14, 4096  ;;  %p3186_p6 = scmp.lt.s32.totalorder %s21_s14, %s21_s14 }
  0x2d   :  { %p3182_p5 = scmp.ne.s32.totalorder %s21_s14, %s3181_s9  ;;  %p3187_p7 = scmp.lt.s32.totalorder %s3181_s9, %s3181_s9 }
  0x2f   :  { %p3188_p8 = por %p3187_p7, %p3186_p6 }
  0x31   :  { %p3189_p9 = pnand %p3188_p8, %p3182_p5 }
  0x33   :  { %3192 = shalt.err (!%p3189_p9)
}
  0x34   :  { %26 = dma.hbm_to_vmem [thread:$0]  %s4255_s0, 4096, %s21_s14, [#allocation3], %s3272_s22, %s3272_s22, %s3273_s23  }
  0x35   :  { %s3274_s11 = smov [#allocation7]   ;;  %s3275_s13 = smov [#allocation10]  }
  0x36   :  { %s44_s12 = sshll.u32 %s3274_s11, 4  ;;  %s68_s15 = sshll.u32 %s3275_s13, 4  ;;  %s45_s12 = int_to_ptr.vmem [resolvable:$true] %s44_s12  ;;  %s69_s15 = int_to_ptr.vmem [resolvable:$true] %s68_s15 }
  0x37   :  { %s3193_s18 = scalar_lea.hbm %s4257_s2, 2048 }
  0x38   :  { %p3194_p10 = scmp.ne.s32.totalorder %s4257_s2, %s3193_s18  ;;  %p3197_p11 = scmp.lt.u32.totalorder %s3193_s18, %s4257_s2 }
  0x3a   :  { %p3199_p12 = pnand %p3197_p11, %p3194_p10 }
  0x3c   :  { %3202 = shalt.err (!%p3199_p12)
}
  0x3d   :  { %s3203_s0 = scalar_lea.vmem %s45_s12, 2048  ;;  %p3208_p0 = scmp.lt.s32.totalorder %s45_s12, %s45_s12 }
  0x3e   :  { %p3204_p13 = scmp.ne.s32.totalorder %s45_s12, %s3203_s0  ;;  %p3209_p1 = scmp.lt.s32.totalorder %s3203_s0, %s3203_s0 }
  0x40   :  { %p3210_p2 = por %p3209_p1, %p3208_p0 }
  0x42   :  { %p3211_p3 = pnand %p3210_p2, %p3204_p13 }
  0x44   :  { %3214 = shalt.err (!%p3211_p3)
}
  0x45   :  { %50 = dma.hbm_to_vmem [thread:$0]  %s4257_s2, 2048, %s45_s12, [#allocation6], %s3272_s22, %s3272_s22, %s3273_s23  }
  0x46   :  { %s3215_s27 = scalar_lea.hbm %s4259_s4, 2048 }
  0x47   :  { %p3216_p4 = scmp.ne.s32.totalorder %s4259_s4, %s3215_s27  ;;  %p3219_p5 = scmp.lt.u32.totalorder %s3215_s27, %s4259_s4 }
  0x49   :  { %p3221_p6 = pnand %p3219_p5, %p3216_p4 }
  0x4b   :  { %3224 = shalt.err (!%p3221_p6)
}
  0x4c   :  { %s3225_s8 = scalar_lea.vmem %s69_s15, 2048  ;;  %p3230_p8 = scmp.lt.s32.totalorder %s69_s15, %s69_s15 }
  0x4d   :  { %p3226_p7 = scmp.ne.s32.totalorder %s69_s15, %s3225_s8  ;;  %p3231_p9 = scmp.lt.s32.totalorder %s3225_s8, %s3225_s8 }
  0x4f   :  { %p3232_p10 = por %p3231_p9, %p3230_p8 }
  0x51   :  { %p3233_p11 = pnand %p3232_p10, %p3226_p7 }
  0x53   :  { %3236 = shalt.err (!%p3233_p11)
}
  0x54   :  { %74 = dma.hbm_to_vmem [thread:$0]  %s4259_s4, 2048, %s69_s15, [#allocation9], %s3272_s22, %s3272_s22, %s3273_s23  }
  0x55   :  { %3259 = dma.done.wait [#allocation3], 4096  }
  0x56   :  { %3260 = vsyncadd [#allocation3], 4294963200 }
  0x57   :  { %3261 = dma.done.wait [#allocation6], 4096  }
  0x58   :  { %3262 = vsyncadd [#allocation6], 4294963200 }
  0x59   :  { %3263 = dma.done.wait [#allocation9], 4096  }
  0x5a   :  { %3264 = vsyncadd [#allocation9], 4294963200  ;;  %v4262_v0 = vmov 0   ;;  %v2830_v1 = vld [vmem:[#allocation7 + $0x4] ss:$8 sps:$4 sm:$0xff]   ;;  %v2856_v19 = vld [vmem:[#allocation5 + $0x10] sm:$0xff]  }
  0x5b   :  { %382 = vmatprep.mubr.bf16.mxu0 %v4262_v0  ;;  %v2832_v2 = vld [vmem:[#allocation7] ss:$8 sps:$4 sm:$0xff]   ;;  %350 = vmatprep.subr.bf16.mxu0 %v2830_v1  ;;  %v2833_v3 = vld [vmem:[#allocation7 + $0x14] ss:$8 sps:$4 sm:$0xff]   ;;  %v2835_v4 = vld [vmem:[#allocation7 + $0x10] ss:$8 sps:$4 sm:$0xff]  }
  0x5c   :  { %351 = vmatpush1.bf16.msra.mxu0 %v2832_v2  ;;  %v2836_v5 = vld [vmem:[#allocation7 + $0x24] ss:$8 sps:$4 sm:$0xff]   ;;  %v2838_v6 = vld [vmem:[#allocation7 + $0x20] ss:$8 sps:$4 sm:$0xff]   ;;  %v2839_v7 = vld [vmem:[#allocation7 + $0x34] ss:$8 sps:$4 sm:$0xff]  }
  0x5d   :  { %352 = vmatprep.subr.bf16.mxu0 %v2833_v3  ;;  %v2841_v8 = vld [vmem:[#allocation7 + $0x30] ss:$8 sps:$4 sm:$0xff]   ;;  %v2842_v9 = vld [vmem:[#allocation7 + $0x44] ss:$8 sps:$4 sm:$0xff]   ;;  %v2844_v10 = vld [vmem:[#allocation7 + $0x40] ss:$8 sps:$4 sm:$0xff]  }
  0x5e   :  { %v2845_v11 = vld [vmem:[#allocation7 + $0x54] ss:$8 sps:$4 sm:$0xff]   ;;  %v2847_v12 = vld [vmem:[#allocation7 + $0x50] ss:$8 sps:$4 sm:$0xff]   ;;  %v2848_v13 = vld [vmem:[#allocation7 + $0x64] ss:$8 sps:$4 sm:$0xff]  }
  0x5f   :  { %v2850_v14 = vld [vmem:[#allocation7 + $0x60] ss:$8 sps:$4 sm:$0xff]   ;;  %v2851_v15 = vld [vmem:[#allocation7 + $0x74] ss:$8 sps:$4 sm:$0xff]   ;;  %v2853_v16 = vld [vmem:[#allocation7 + $0x70] ss:$8 sps:$4 sm:$0xff]  }
  0x60   :  { %353 = vmatpush1.bf16.msra.mxu0 %v2835_v4  ;;  %v2854_v17 = vld [vmem:[#allocation5] sm:$0xff]   ;;  %v2855_v18 = vld [vmem:[#allocation5 + $0x8] sm:$0xff]   ;;  %v2857_v20 = vld [vmem:[#allocation5 + $0x18] sm:$0xff]  }
  0x61   :  { %354 = vmatprep.subr.bf16.mxu0 %v2836_v5  ;;  %v2858_v21 = vld [vmem:[#allocation5 + $0x20] sm:$0xff]   ;;  %v2859_v22 = vld [vmem:[#allocation5 + $0x28] sm:$0xff]   ;;  %v2860_v23 = vld [vmem:[#allocation5 + $0x30] sm:$0xff]  }
  0x62   :  { %v2861_v24 = vld [vmem:[#allocation5 + $0x38] sm:$0xff]   ;;  %v2862_v25 = vld [vmem:[#allocation5 + $0x40] sm:$0xff]   ;;  %v2863_v26 = vld [vmem:[#allocation5 + $0x48] sm:$0xff]  }
  0x63   :  { %v2864_v27 = vld [vmem:[#allocation5 + $0x50] sm:$0xff]   ;;  %v2865_v28 = vld [vmem:[#allocation5 + $0x58] sm:$0xff]   ;;  %v2866_v29 = vld [vmem:[#allocation5 + $0x60] sm:$0xff]  }
  0x64   :  { %355 = vmatpush1.bf16.msra.mxu0 %v2838_v6  ;;  %v2867_v30 = vld [vmem:[#allocation5 + $0x68] sm:$0xff]   ;;  %v2868_v31 = vld [vmem:[#allocation5 + $0x70] sm:$0xff]   ;;  %v2869_v32 = vld [vmem:[#allocation5 + $0x78] sm:$0xff]  }
  0x65   :  { %356 = vmatprep.subr.bf16.mxu0 %v2839_v7  ;;  %v3402_v33 = vld [vmem:[#allocation2 + $0x4] ss:$8 sps:$4 sm:$0xff]  }
  0x66   :  { %751 = vmatprep.mubr.bf16.mxu1 %v3402_v33 }
  0x68   :  { %357 = vmatpush1.bf16.msra.mxu0 %v2841_v8 }
  0x69   :  { %358 = vmatprep.subr.bf16.mxu0 %v2842_v9 }
  0x6c   :  { %359 = vmatpush1.bf16.msra.mxu0 %v2844_v10 }
  0x6d   :  { %360 = vmatprep.subr.bf16.mxu0 %v2845_v11 }
  0x70   :  { %361 = vmatpush1.bf16.msra.mxu0 %v2847_v12 }
  0x71   :  { %362 = vmatprep.subr.bf16.mxu0 %v2848_v13 }
  0x74   :  { %363 = vmatpush1.bf16.msra.mxu0 %v2850_v14 }
  0x75   :  { %364 = vmatprep.subr.bf16.mxu0 %v2851_v15 }
  0x78   :  { %365 = vmatpush1.bf16.msra.mxu0 %v2853_v16 }
  0x7b   :  { %383 = vmatmul.mubr.bf16.vlgmr.msra.gmra.mrb[0].mxu0 %v2854_v17 }
  0x7c   :  { %392 = vmatprep.mubr.bf16.mxu0 %v4262_v0 }
  0x83   :  { %393 = vmatmul.mubr.bf16.gmra.mrb[4].mxu0 %v2855_v18 }
  0x84   :  { %402 = vmatprep.mubr.bf16.mxu0 %v4262_v0 }
  0x8b   :  { %403 = vmatmul.mubr.bf16.gmra.mrb[8].mxu0 %v2856_v19 }
  0x8c   :  { %412 = vmatprep.mubr.bf16.mxu0 %v4262_v0 }
  0x93   :  { %413 = vmatmul.mubr.bf16.gmra.mrb[12].mxu0 %v2857_v20 }
  0x94   :  { %422 = vmatprep.mubr.bf16.mxu0 %v4262_v0 }
  0x9b   :  { %423 = vmatmul.mubr.bf16.gmra.mrb[16].mxu0 %v2858_v21 }
  0x9c   :  { %432 = vmatprep.mubr.bf16.mxu0 %v4262_v0 }
  0xa3   :  { %433 = vmatmul.mubr.bf16.gmra.mrb[20].mxu0 %v2859_v22 }
  0xa4   :  { %442 = vmatprep.mubr.bf16.mxu0 %v4262_v0 }
  0xab   :  { %443 = vmatmul.mubr.bf16.gmra.mrb[24].mxu0 %v2860_v23 }
  0xac   :  { %452 = vmatprep.mubr.bf16.mxu0 %v4262_v0 }
  0xb3   :  { %453 = vmatmul.mubr.bf16.gmra.mrb[28].mxu0 %v2861_v24 }
  0xb4   :  { %462 = vmatprep.mubr.bf16.mxu0 %v4262_v0 }
  0xbb   :  { %463 = vmatmul.mubr.bf16.gmra.mrb[32].mxu0 %v2862_v25 }
  0xbc   :  { %472 = vmatprep.mubr.bf16.mxu0 %v4262_v0 }
  0xc3   :  { %473 = vmatmul.mubr.bf16.gmra.mrb[36].mxu0 %v2863_v26 }
  0xc4   :  { %482 = vmatprep.mubr.bf16.mxu0 %v4262_v0 }
  0xcb   :  { %483 = vmatmul.mubr.bf16.gmra.mrb[40].mxu0 %v2864_v27 }
  0xcc   :  { %492 = vmatprep.mubr.bf16.mxu0 %v4262_v0 }
  0xd3   :  { %493 = vmatmul.mubr.bf16.gmra.mrb[44].mxu0 %v2865_v28 }
  0xd4   :  { %502 = vmatprep.mubr.bf16.mxu0 %v4262_v0 }
  0xdb   :  { %503 = vmatmul.mubr.bf16.gmra.mrb[48].mxu0 %v2866_v29 }
  0xdc   :  { %512 = vmatprep.mubr.bf16.mxu0 %v4262_v0 }
  0xe3   :  { %513 = vmatmul.mubr.bf16.gmra.mrb[52].mxu0 %v2867_v30 }
  0xe4   :  { %522 = vmatprep.mubr.bf16.mxu0 %v4262_v0 }
  0xeb   :  { %523 = vmatmul.mubr.bf16.gmra.mrb[56].mxu0 %v2868_v31 }
  0xec   :  { %532 = vmatprep.mubr.bf16.mxu0 %v4262_v0 }
  0xf3   :  { %533 = vmatmul.mubr.bf16.gmra.mrb[60].mxu0 %v2869_v32 }
  0xf4   :  { %1092 = vmatprep.mubr.bf16.mxu0 %v4262_v0  ;;  %v2939_v0 = vld [vmem:[#allocation8 + $0x70] ss:$8 sps:$4 sm:$0xff]  }
 0x14e   :  { %v384_v34 = vpop.f32.mrb[0].mxu0 }
 0x14f   :  { %v3405_v35 = vpop.f32.mrb[1].mxu0 }
 0x150   :  { %v388_v36 = vpop.f32.mrb[2].mxu0 }
 0x151   :  { %v543_v37 = vpack.c.bf16 %v388_v36, %v384_v34  ;;  %v3407_v38 = vpop.f32.mrb[3].mxu0 }
 0x156   :  { %v394_v39 = vpop.f32.mrb[4].mxu0 }
 0x157   :  { %v3409_v40 = vpop.f32.mrb[5].mxu0 }
 0x158   :  { %v398_v41 = vpop.f32.mrb[6].mxu0 }
 0x159   :  { %v544_v42 = vpack.c.bf16 %v398_v41, %v394_v39  ;;  %v3411_v43 = vpop.f32.mrb[7].mxu0 }
 0x15e   :  { %v404_v44 = vpop.f32.mrb[8].mxu0 }
 0x15f   :  { %v3413_v45 = vpop.f32.mrb[9].mxu0 }
 0x160   :  { %v408_v46 = vpop.f32.mrb[10].mxu0 }
 0x161   :  { %v545_v47 = vpack.c.bf16 %v408_v46, %v404_v44  ;;  %v3415_v48 = vpop.f32.mrb[11].mxu0 }
 0x166   :  { %v414_v49 = vpop.f32.mrb[12].mxu0 }
 0x167   :  { %v3417_v50 = vpop.f32.mrb[13].mxu0 }
 0x168   :  { %v418_v51 = vpop.f32.mrb[14].mxu0 }
 0x169   :  { %v546_v52 = vpack.c.bf16 %v418_v51, %v414_v49  ;;  %v3419_v53 = vpop.f32.mrb[15].mxu0 }
 0x16e   :  { %v424_v54 = vpop.f32.mrb[16].mxu0 }
 0x16f   :  { %v3421_v55 = vpop.f32.mrb[17].mxu0 }
 0x170   :  { %v428_v56 = vpop.f32.mrb[18].mxu0 }
 0x171   :  { %v547_v57 = vpack.c.bf16 %v428_v56, %v424_v54  ;;  %v3423_v58 = vpop.f32.mrb[19].mxu0 }
 0x176   :  { %v434_v59 = vpop.f32.mrb[20].mxu0 }
 0x177   :  { %v3425_v60 = vpop.f32.mrb[21].mxu0 }
 0x178   :  { %v438_v61 = vpop.f32.mrb[22].mxu0 }
 0x179   :  { %v548_v62 = vpack.c.bf16 %v438_v61, %v434_v59  ;;  %v3427_v63 = vpop.f32.mrb[23].mxu0  ;;  %v2918_v59 = vld [vmem:[#allocation8] ss:$8 sps:$4 sm:$0xff]   ;;  %v2920_v61 = vld [vmem:[#allocation8 + $0x4] ss:$8 sps:$4 sm:$0xff]  }
 0x17a   :  { %1060 = vmatprep.subr.bf16.mxu0 %v2920_v61  ;;  %v3534_v61 = vld [vmem:[#allocation2 + $0xa4] ss:$8 sps:$4 sm:$0xff]  }
 0x17b   :  { %1061 = vmatpush1.bf16.msra.mxu0 %v2918_v59  ;;  %v3532_v59 = vld [vmem:[#allocation2 + $0x90] ss:$8 sps:$4 sm:$0xff]   ;;  %4291 = vst [vmem:[#allocation22_spill] sm:$0xff] %v3534_v61 }
 0x17c   :  { %4290 = vst [vmem:[#allocation21_spill] sm:$0xff] %v3532_v59 }
 0x17e   :  { %v444_v1 = vpop.f32.mrb[24].mxu0 }
 0x17f   :  { %v3429_v2 = vpop.f32.mrb[25].mxu0 }
 0x180   :  { %v448_v3 = vpop.f32.mrb[26].mxu0 }
 0x181   :  { %v549_v4 = vpack.c.bf16 %v448_v3, %v444_v1  ;;  %v3431_v5 = vpop.f32.mrb[27].mxu0  ;;  %v2923_v3 = vld [vmem:[#allocation8 + $0x14] ss:$8 sps:$4 sm:$0xff]  }
 0x182   :  { %1062 = vmatprep.subr.bf16.mxu0 %v2923_v3  ;;  %v3540_v3 = vld [vmem:[#allocation2 + $0xb4] ss:$8 sps:$4 sm:$0xff]  }
 0x183   :  { %4293 = vst [vmem:[#allocation24_spill] sm:$0xff] %v3540_v3 }
 0x186   :  { %v3433_v6 = vpop.f32.mrb[28].mxu0 }
 0x187   :  { %v3435_v7 = vpop.f32.mrb[29].mxu0 }
 0x188   :  { %v3437_v8 = vpop.f32.mrb[30].mxu0 }
 0x189   :  { %v550_v9 = vpack.c.bf16 %v3437_v8, %v3433_v6  ;;  %v3441_v10 = vpop.f32.mrb[31].mxu0  ;;  %v2930_v6 = vld [vmem:[#allocation8 + $0x40] ss:$8 sps:$4 sm:$0xff]  }
 0x18a   :  { %v3490_v8 = vld [vmem:[#allocation2 + $0x20] ss:$8 sps:$4 sm:$0xff]  }
 0x18e   :  { %v464_v11 = vpop.f32.mrb[32].mxu0 }
 0x18f   :  { %v3443_v12 = vpop.f32.mrb[33].mxu0 }
 0x190   :  { %v468_v13 = vpop.f32.mrb[34].mxu0 }
 0x191   :  { %v3445_v14 = vpop.f32.mrb[35].mxu0  ;;  %v551_v15 = vpack.c.bf16 %v468_v13, %v464_v11 }
 0x193   :  { %2483 = vmatprep.subr.bf16.mxu1 %v551_v15  ;;  %v3475_v15 = vld [vmem:[#allocation2] ss:$8 sps:$4 sm:$0xff]  }
 0x194   :  { %2484 = vmatpush3.bf16.msra.mxu1 %v543_v37 }
 0x196   :  { %v474_v16 = vpop.f32.mrb[36].mxu0 }
 0x197   :  { %v3447_v17 = vpop.f32.mrb[37].mxu0 }
 0x198   :  { %v478_v18 = vpop.f32.mrb[38].mxu0 }
 0x199   :  { %v552_v19 = vpack.c.bf16 %v478_v18, %v474_v16  ;;  %v3449_v20 = vpop.f32.mrb[39].mxu0  ;;  %v2926_v16 = vld [vmem:[#allocation8 + $0x24] ss:$8 sps:$4 sm:$0xff]   ;;  %v2924_v18 = vld [vmem:[#allocation8 + $0x20] ss:$8 sps:$4 sm:$0xff]  }
 0x19b   :  { %2485 = vmatprep.subr.bf16.mxu1 %v552_v19  ;;  %v2929_v19 = vld [vmem:[#allocation8 + $0x34] ss:$8 sps:$4 sm:$0xff]  }
 0x19c   :  { %2486 = vmatpush3.bf16.msra.mxu1 %v544_v42 }
 0x19e   :  { %v484_v21 = vpop.f32.mrb[40].mxu0 }
 0x19f   :  { %v3451_v22 = vpop.f32.mrb[41].mxu0 }
 0x1a0   :  { %v488_v23 = vpop.f32.mrb[42].mxu0 }
 0x1a1   :  { %v553_v24 = vpack.c.bf16 %v488_v23, %v484_v21  ;;  %v3453_v25 = vpop.f32.mrb[43].mxu0  ;;  %v2927_v21 = vld [vmem:[#allocation8 + $0x30] ss:$8 sps:$4 sm:$0xff]  }
 0x1a2   :  { %v3484_v23 = vld [vmem:[#allocation2 + $0x10] ss:$8 sps:$4 sm:$0xff]  }
 0x1a3   :  { %2487 = vmatprep.subr.bf16.mxu1 %v553_v24  ;;  %v2932_v24 = vld [vmem:[#allocation8 + $0x44] ss:$8 sps:$4 sm:$0xff]  }
 0x1a4   :  { %2488 = vmatpush3.bf16.msra.mxu1 %v545_v47 }
 0x1a6   :  { %v494_v26 = vpop.f32.mrb[44].mxu0 }
 0x1a7   :  { %v3455_v27 = vpop.f32.mrb[45].mxu0 }
 0x1a8   :  { %v498_v28 = vpop.f32.mrb[46].mxu0 }
 0x1a9   :  { %v554_v29 = vpack.c.bf16 %v498_v28, %v494_v26  ;;  %v3457_v30 = vpop.f32.mrb[47].mxu0  ;;  %v3486_v26 = vld [vmem:[#allocation2 + $0x24] ss:$8 sps:$4 sm:$0xff]   ;;  %v3496_v28 = vld [vmem:[#allocation2 + $0x30] ss:$8 sps:$4 sm:$0xff]  }
 0x1ab   :  { %2489 = vmatprep.subr.bf16.mxu1 %v554_v29  ;;  %v3498_v29 = vld [vmem:[#allocation2 + $0x44] ss:$8 sps:$4 sm:$0xff]  }
 0x1ac   :  { %2490 = vmatpush3.bf16.msra.mxu1 %v546_v52 }
 0x1ae   :  { %v504_v31 = vpop.f32.mrb[48].mxu0 }
 0x1af   :  { %v3459_v32 = vpop.f32.mrb[49].mxu0 }
 0x1b0   :  { %v508_v34 = vpop.f32.mrb[50].mxu0 }
 0x1b1   :  { %v555_v36 = vpack.c.bf16 %v508_v34, %v504_v31  ;;  %v3461_v37 = vpop.f32.mrb[51].mxu0  ;;  %v3502_v31 = vld [vmem:[#allocation2 + $0x40] ss:$8 sps:$4 sm:$0xff]   ;;  %v3504_v34 = vld [vmem:[#allocation2 + $0x54] ss:$8 sps:$4 sm:$0xff]  }
 0x1b3   :  { %2491 = vmatprep.subr.bf16.mxu1 %v555_v36  ;;  %v3508_v36 = vld [vmem:[#allocation2 + $0x50] ss:$8 sps:$4 sm:$0xff]  }
 0x1b4   :  { %2492 = vmatpush3.bf16.msra.mxu1 %v547_v57 }
 0x1b6   :  { %v514_v39 = vpop.f32.mrb[52].mxu0 }
 0x1b7   :  { %v3463_v41 = vpop.f32.mrb[53].mxu0 }
 0x1b8   :  { %v518_v42 = vpop.f32.mrb[54].mxu0 }
 0x1b9   :  { %v556_v44 = vpack.c.bf16 %v518_v42, %v514_v39  ;;  %v3465_v46 = vpop.f32.mrb[55].mxu0  ;;  %v3510_v39 = vld [vmem:[#allocation2 + $0x64] ss:$8 sps:$4 sm:$0xff]   ;;  %v3514_v42 = vld [vmem:[#allocation2 + $0x60] ss:$8 sps:$4 sm:$0xff]  }
 0x1bb   :  { %2493 = vmatprep.subr.bf16.mxu1 %v556_v44  ;;  %v3516_v44 = vld [vmem:[#allocation2 + $0x74] ss:$8 sps:$4 sm:$0xff]  }
 0x1bc   :  { %2494 = vmatpush3.bf16.msra.mxu1 %v548_v62  ;;  %v2921_v62 = vld [vmem:[#allocation8 + $0x10] ss:$8 sps:$4 sm:$0xff]   ;;  %4285 = vst [vmem:[#allocation16_spill] sm:$0xff] %v3516_v44 }
 0x1bd   :  { %1063 = vmatpush1.bf16.msra.mxu0 %v2921_v62  ;;  %v3544_v62 = vld [vmem:[#allocation2 + $0xb0] ss:$8 sps:$4 sm:$0xff]  }
 0x1be   :  { %v524_v47 = vpop.f32.mrb[56].mxu0  ;;  %1064 = vmatprep.subr.bf16.mxu0 %v2926_v16  ;;  %4294 = vst [vmem:[#allocation25_spill] sm:$0xff] %v3544_v62  ;;  %v2933_v16 = vld [vmem:[#allocation8 + $0x50] ss:$8 sps:$4 sm:$0xff]  }
 0x1bf   :  { %v3467_v49 = vpop.f32.mrb[57].mxu0 }
 0x1c0   :  { %v528_v51 = vpop.f32.mrb[58].mxu0 }
 0x1c1   :  { %v557_v52 = vpack.c.bf16 %v528_v51, %v524_v47  ;;  %v3469_v54 = vpop.f32.mrb[59].mxu0  ;;  %1065 = vmatpush1.bf16.msra.mxu0 %v2924_v18  ;;  %v3520_v47 = vld [vmem:[#allocation2 + $0x70] ss:$8 sps:$4 sm:$0xff]   ;;  %v3522_v51 = vld [vmem:[#allocation2 + $0x84] ss:$8 sps:$4 sm:$0xff]  }
 0x1c2   :  { %1066 = vmatprep.subr.bf16.mxu0 %v2929_v19  ;;  %4286 = vst [vmem:[#allocation17_spill] sm:$0xff] %v3520_v47  ;;  %4287 = vst [vmem:[#allocation18_spill] sm:$0xff] %v3522_v51  ;;  %v3546_v18 = vld [vmem:[#allocation2 + $0xc4] ss:$8 sps:$4 sm:$0xff]  }
 0x1c3   :  { %2495 = vmatprep.subr.bf16.mxu1 %v557_v52  ;;  %v3526_v52 = vld [vmem:[#allocation2 + $0x80] ss:$8 sps:$4 sm:$0xff]   ;;  %4295 = vst [vmem:[#allocation26_spill] sm:$0xff] %v3546_v18  ;;  %v2938_v19 = vld [vmem:[#allocation8 + $0x64] ss:$8 sps:$4 sm:$0xff]  }
 0x1c4   :  { %2496 = vmatpush3.bf16.msra.mxu1 %v549_v4  ;;  %v3480_v4 = vld [vmem:[#allocation2 + $0x14] ss:$8 sps:$4 sm:$0xff]   ;;  %4288 = vst [vmem:[#allocation19_spill] sm:$0xff] %v3526_v52 }
 0x1c5   :  { %1067 = vmatpush1.bf16.msra.mxu0 %v2927_v21  ;;  %v2936_v21 = vld [vmem:[#allocation8 + $0x60] ss:$8 sps:$4 sm:$0xff]  }
 0x1c6   :  { %v534_v56 = vpop.f32.mrb[60].mxu0  ;;  %1068 = vmatprep.subr.bf16.mxu0 %v2932_v24  ;;  %v2941_v24 = vld [vmem:[#allocation8 + $0x74] ss:$8 sps:$4 sm:$0xff]  }
 0x1c7   :  { %v3471_v57 = vpop.f32.mrb[61].mxu0 }
 0x1c8   :  { %v538_v1 = vpop.f32.mrb[62].mxu0 }
 0x1c9   :  { %v558_v11 = vpack.c.bf16 %v538_v1, %v534_v56  ;;  %v3473_v13 = vpop.f32.mrb[63].mxu0  ;;  %1069 = vmatpush1.bf16.msra.mxu0 %v2930_v6  ;;  %v3528_v56 = vld [vmem:[#allocation2 + $0x94] ss:$8 sps:$4 sm:$0xff]   ;;  %v3538_v1 = vld [vmem:[#allocation2 + $0xa0] ss:$8 sps:$4 sm:$0xff]  }
 0x1ca   :  { %4289 = vst [vmem:[#allocation20_spill] sm:$0xff] %v3528_v56  ;;  %4292 = vst [vmem:[#allocation23_spill] sm:$0xff] %v3538_v1  ;;  %v3550_v6 = vld [vmem:[#allocation2 + $0xc0] ss:$8 sps:$4 sm:$0xff]  }
 0x1cb   :  { %2497 = vmatprep.subr.bf16.mxu1 %v558_v11  ;;  %v2935_v11 = vld [vmem:[#allocation8 + $0x54] ss:$8 sps:$4 sm:$0xff]   ;;  %4296 = vst [vmem:[#allocation27_spill] sm:$0xff] %v3550_v6 }
 0x1cc   :  { %2498 = vmatpush3.bf16.msra.mxu1 %v550_v9  ;;  %v3492_v9 = vld [vmem:[#allocation2 + $0x34] ss:$8 sps:$4 sm:$0xff]   ;;  %1070 = vmatprep.subr.bf16.mxu0 %v2935_v11  ;;  %v3556_v11 = vld [vmem:[#allocation2 + $0xd0] ss:$8 sps:$4 sm:$0xff]  }
 0x1cd   :  { %1071 = vmatpush1.bf16.msra.mxu0 %v2933_v16  ;;  %4298 = vst [vmem:[#allocation29_spill] sm:$0xff] %v3556_v11  ;;  %v3558_v16 = vld [vmem:[#allocation2 + $0xe4] ss:$8 sps:$4 sm:$0xff]  }
 0x1ce   :  { %1072 = vmatprep.subr.bf16.mxu0 %v2938_v19  ;;  %4299 = vst [vmem:[#allocation30_spill] sm:$0xff] %v3558_v16  ;;  %v3562_v19 = vld [vmem:[#allocation2 + $0xe0] ss:$8 sps:$4 sm:$0xff]  }
 0x1cf   :  { %752 = vmatmul.mubr.bf16.vlgmr.msra.gmra.mrb[0].mxu1 %v3475_v15  ;;  %4300 = vst [vmem:[#allocation31_spill] sm:$0xff] %v3562_v19 }
 0x1d0   :  { %759 = vmatprep.mubr.bf16.mxu1 %v3480_v4 }
 0x1d1   :  { %1073 = vmatpush1.bf16.msra.mxu0 %v2936_v21  ;;  %v3564_v21 = vld [vmem:[#allocation2 + $0xf4] ss:$8 sps:$4 sm:$0xff]  }
 0x1d2   :  { %1074 = vmatprep.subr.bf16.mxu0 %v2941_v24  ;;  %4301 = vst [vmem:[#allocation32_spill] sm:$0xff] %v3564_v21  ;;  %v880_v24 = vlaneseq }
 0x1d5   :  { %1075 = vmatpush1.bf16.msra.mxu0 %v2939_v0  ;;  %v3568_v0 = vld [vmem:[#allocation2 + $0xf0] ss:$8 sps:$4 sm:$0xff]  }
 0x1d6   :  { %4302 = vst [vmem:[#allocation33_spill] sm:$0xff] %v3568_v0 }
 0x1d7   :  { %760 = vmatmul.mubr.bf16.gmra.mrb[4].mxu1 %v3484_v23 }
 0x1d8   :  { %767 = vmatprep.mubr.bf16.mxu1 %v3486_v26 }
 0x1df   :  { %768 = vmatmul.mubr.bf16.gmra.mrb[8].mxu1 %v3490_v8 }
 0x1e0   :  { %775 = vmatprep.mubr.bf16.mxu1 %v3492_v9 }
 0x1e7   :  { %776 = vmatmul.mubr.bf16.gmra.mrb[12].mxu1 %v3496_v28 }
 0x1e8   :  { %783 = vmatprep.mubr.bf16.mxu1 %v3498_v29 }
 0x1ef   :  { %784 = vmatmul.mubr.bf16.gmra.mrb[16].mxu1 %v3502_v31 }
 0x1f0   :  { %791 = vmatprep.mubr.bf16.mxu1 %v3504_v34 }
 0x1f7   :  { %792 = vmatmul.mubr.bf16.gmra.mrb[20].mxu1 %v3508_v36 }
 0x1f8   :  { %799 = vmatprep.mubr.bf16.mxu1 %v3510_v39 }
 0x1ff   :  { %800 = vmatmul.mubr.bf16.gmra.mrb[24].mxu1 %v3514_v42 }
 0x200   :  { %807 = vmatprep.mubr.bf16.mxu1 %v3516_v44 }
 0x207   :  { %808 = vmatmul.mubr.bf16.gmra.mrb[28].mxu1 %v3520_v47 }
 0x208   :  { %815 = vmatprep.mubr.bf16.mxu1 %v3522_v51 }
 0x20f   :  { %816 = vmatmul.mubr.bf16.gmra.mrb[32].mxu1 %v3526_v52 }
 0x210   :  { %823 = vmatprep.mubr.bf16.mxu1 %v3528_v56 }
 0x217   :  { %824 = vmatmul.mubr.bf16.gmra.mrb[36].mxu1 %v3532_v59 }
 0x218   :  { %831 = vmatprep.mubr.bf16.mxu1 %v3534_v61 }
 0x21f   :  { %832 = vmatmul.mubr.bf16.gmra.mrb[40].mxu1 %v3538_v1 }
 0x220   :  { %839 = vmatprep.mubr.bf16.mxu1 %v3540_v3  ;;  %v3552_v3 = vld [vmem:[#allocation2 + $0xd4] ss:$8 sps:$4 sm:$0xff]  }
 0x221   :  { %4297 = vst [vmem:[#allocation28_spill] sm:$0xff] %v3552_v3 }
 0x227   :  { %840 = vmatmul.mubr.bf16.gmra.mrb[44].mxu1 %v3544_v62 }
 0x228   :  { %847 = vmatprep.mubr.bf16.mxu1 %v3546_v18 }
 0x22f   :  { %848 = vmatmul.mubr.bf16.gmra.mrb[48].mxu1 %v3550_v6 }
 0x230   :  { %855 = vmatprep.mubr.bf16.mxu1 %v3552_v3  ;;  %v3572_v3 = vshrl.u32 %v880_v24, 7 }
 0x232   :  { %4303 = vst [vmem:[#allocation34_spill] sm:$0xff] %v3572_v3 }
 0x237   :  { %856 = vmatmul.mubr.bf16.gmra.mrb[52].mxu1 %v3556_v11  ;;  %v882_v11 = vsub.s32 0, %v3572_v3 }
 0x238   :  { %863 = vmatprep.mubr.bf16.mxu1 %v3558_v16  ;;  %v3578_v16 = vld [vmem:[%s4260_s5] sm:$0x7] }
 0x239   :  { %4304 = vst [vmem:[#allocation35_spill] sm:$0xff] %v3578_v16 }
 0x23f   :  { %864 = vmatmul.mubr.bf16.gmra.mrb[56].mxu1 %v3562_v19 }
 0x240   :  { %871 = vmatprep.mubr.bf16.mxu1 %v3564_v21  ;;  %v3581_v21 = vrot.slane %v3578_v16, %v882_v11 }
 0x247   :  { %872 = vmatmul.mubr.bf16.gmra.mrb[60].mxu1 %v3568_v0 }
 0x248   :  { %1301 = vmatprep.mubr.bf16.mxu1 %v3402_v33 }
 0x2a2   :  { %v2499_v6 = vpop.f32.mrb[0].mxu1 }
 0x2a3   :  { %v2500_v19 = vpop.f32.mrb[1].mxu1 }
 0x2a4   :  { %v2501_v18 = vadd.f32 %v2500_v19, %v2499_v6  ;;  %v2502_v62 = vpop.f32.mrb[2].mxu1 }
 0x2a5   :  { %v2503_v0 = vpop.f32.mrb[3].mxu1 }
 0x2a6   :  { %v754_v33 = vadd.f32 %v2501_v18, %v3405_v35  ;;  %v2504_v1 = vadd.f32 %v2503_v0, %v2502_v62  ;;  %v4305_v18 = vmov 0  }
 0x2a8   :  { %v884_v24 = vadd.f32 %v3581_v21, %v754_v33  ;;  %v757_v3 = vadd.f32 %v2504_v1, %v3407_v38 }
 0x2aa   :  { %v885_v61 = vadd.f32 %v3581_v21, %v757_v3  ;;  %v2505_v59 = vpop.f32.mrb[4].mxu1  ;;  %v916_v52 = vmax.f32 %v884_v24, 0.0 }
 0x2ab   :  { %v2506_v56 = vpop.f32.mrb[5].mxu1 }
 0x2ac   :  { %v917_v51 = vmax.f32 %v885_v61, 0.0  ;;  %v2507_v47 = vadd.f32 %v2506_v56, %v2505_v59  ;;  %v2508_v6 = vpop.f32.mrb[6].mxu1 }
 0x2ad   :  { %v2509_v19 = vpop.f32.mrb[7].mxu1 }
 0x2ae   :  { %v948_v11 = vpack.c.bf16 %v917_v51, %v916_v52  ;;  %v762_v16 = vadd.f32 %v2507_v47, %v3409_v40  ;;  %v2510_v44 = vadd.f32 %v2509_v19, %v2508_v6 }
 0x2b0   :  { %v886_v35 = vadd.f32 %v3581_v21, %v762_v16  ;;  %v765_v62 = vadd.f32 %v2510_v44, %v3411_v43  ;;  %1093 = vmatmul.mubr.bf16.vlgmr.msra.gmra.mrb[64].mxu0 %v948_v11 }
 0x2b1   :  { %1102 = vmatprep.mubr.bf16.mxu0 %v4305_v18 }
 0x2b2   :  { %v887_v38 = vadd.f32 %v3581_v21, %v765_v62  ;;  %v2511_v1 = vpop.f32.mrb[8].mxu1  ;;  %v918_v0 = vmax.f32 %v886_v35, 0.0 }
 0x2b3   :  { %v2512_v3 = vpop.f32.mrb[9].mxu1 }
 0x2b4   :  { %v919_v61 = vmax.f32 %v887_v38, 0.0  ;;  %v2513_v56 = vadd.f32 %v2512_v3, %v2511_v1  ;;  %v2514_v59 = vpop.f32.mrb[10].mxu1 }
 0x2b5   :  { %v2515_v33 = vpop.f32.mrb[11].mxu1 }
 0x2b6   :  { %v770_v51 = vadd.f32 %v2513_v56, %v3413_v45  ;;  %v2516_v40 = vadd.f32 %v2515_v33, %v2514_v59  ;;  %v949_v47 = vpack.c.bf16 %v919_v61, %v918_v0 }
 0x2b8   :  { %v888_v52 = vadd.f32 %v3581_v21, %v770_v51  ;;  %v773_v43 = vadd.f32 %v2516_v40, %v3415_v48  ;;  %1103 = vmatmul.mubr.bf16.gmra.mrb[68].mxu0 %v949_v47 }
 0x2b9   :  { %1112 = vmatprep.mubr.bf16.mxu0 %v4305_v18 }
 0x2ba   :  { %v889_v44 = vadd.f32 %v3581_v21, %v773_v43  ;;  %v2517_v16 = vpop.f32.mrb[12].mxu1  ;;  %v920_v6 = vmax.f32 %v888_v52, 0.0 }
 0x2bb   :  { %v2518_v24 = vpop.f32.mrb[13].mxu1 }
 0x2bc   :  { %v921_v19 = vmax.f32 %v889_v44, 0.0  ;;  %v2519_v11 = vadd.f32 %v2518_v24, %v2517_v16  ;;  %v2520_v35 = vpop.f32.mrb[14].mxu1 }
 0x2bd   :  { %v2521_v62 = vpop.f32.mrb[15].mxu1 }
 0x2be   :  { %v778_v45 = vadd.f32 %v2519_v11, %v3417_v50  ;;  %v2522_v38 = vadd.f32 %v2521_v62, %v2520_v35  ;;  %v950_v1 = vpack.c.bf16 %v921_v19, %v920_v6 }
 0x2c0   :  { %v890_v3 = vadd.f32 %v3581_v21, %v778_v45  ;;  %v781_v48 = vadd.f32 %v2522_v38, %v3419_v53  ;;  %1113 = vmatmul.mubr.bf16.gmra.mrb[72].mxu0 %v950_v1 }
 0x2c1   :  { %1122 = vmatprep.mubr.bf16.mxu0 %v4305_v18 }
 0x2c2   :  { %v891_v0 = vadd.f32 %v3581_v21, %v781_v48  ;;  %v2523_v61 = vpop.f32.mrb[16].mxu1  ;;  %v922_v59 = vmax.f32 %v890_v3, 0.0 }
 0x2c3   :  { %v2524_v56 = vpop.f32.mrb[17].mxu1 }
 0x2c4   :  { %v923_v33 = vmax.f32 %v891_v0, 0.0  ;;  %v2525_v51 = vadd.f32 %v2524_v56, %v2523_v61  ;;  %v2526_v40 = vpop.f32.mrb[18].mxu1 }
 0x2c5   :  { %v2527_v47 = vpop.f32.mrb[19].mxu1 }
 0x2c6   :  { %v786_v50 = vadd.f32 %v2525_v51, %v3421_v55  ;;  %v2528_v52 = vadd.f32 %v2527_v47, %v2526_v40  ;;  %v951_v43 = vpack.c.bf16 %v923_v33, %v922_v59 }
 0x2c8   :  { %v892_v44 = vadd.f32 %v3581_v21, %v786_v50  ;;  %v789_v53 = vadd.f32 %v2528_v52, %v3423_v58  ;;  %1123 = vmatmul.mubr.bf16.gmra.mrb[76].mxu0 %v951_v43 }
 0x2c9   :  { %1132 = vmatprep.mubr.bf16.mxu0 %v4305_v18 }
 0x2ca   :  { %v893_v16 = vadd.f32 %v3581_v21, %v789_v53  ;;  %v2529_v24 = vpop.f32.mrb[20].mxu1  ;;  %v924_v19 = vmax.f32 %v892_v44, 0.0 }
 0x2cb   :  { %v2530_v6 = vpop.f32.mrb[21].mxu1 }
 0x2cc   :  { %v925_v11 = vmax.f32 %v893_v16, 0.0  ;;  %v2531_v35 = vadd.f32 %v2530_v6, %v2529_v24  ;;  %v2532_v62 = vpop.f32.mrb[22].mxu1 }
 0x2cd   :  { %v2533_v45 = vpop.f32.mrb[23].mxu1 }
 0x2ce   :  { %v794_v55 = vadd.f32 %v2531_v35, %v3425_v60  ;;  %v2534_v38 = vadd.f32 %v2533_v45, %v2532_v62  ;;  %v952_v1 = vpack.c.bf16 %v925_v11, %v924_v19 }
 0x2d0   :  { %v894_v3 = vadd.f32 %v3581_v21, %v794_v55  ;;  %v797_v58 = vadd.f32 %v2534_v38, %v3427_v63  ;;  %1133 = vmatmul.mubr.bf16.gmra.mrb[80].mxu0 %v952_v1 }
 0x2d1   :  { %1142 = vmatprep.mubr.bf16.mxu0 %v4305_v18 }
 0x2d2   :  { %v895_v48 = vadd.f32 %v3581_v21, %v797_v58  ;;  %v2535_v0 = vpop.f32.mrb[24].mxu1  ;;  %v926_v56 = vmax.f32 %v894_v3, 0.0 }
 0x2d3   :  { %v2536_v61 = vpop.f32.mrb[25].mxu1 }
 0x2d4   :  { %v927_v59 = vmax.f32 %v895_v48, 0.0  ;;  %v2537_v33 = vadd.f32 %v2536_v61, %v2535_v0  ;;  %v2538_v51 = vpop.f32.mrb[26].mxu1 }
 0x2d5   :  { %v2539_v40 = vpop.f32.mrb[27].mxu1 }
 0x2d6   :  { %v802_v60 = vadd.f32 %v2537_v33, %v3429_v2  ;;  %v2540_v47 = vadd.f32 %v2539_v40, %v2538_v51  ;;  %v953_v50 = vpack.c.bf16 %v927_v59, %v926_v56 }
 0x2d8   :  { %v896_v52 = vadd.f32 %v3581_v21, %v802_v60  ;;  %v805_v63 = vadd.f32 %v2540_v47, %v3431_v5  ;;  %1143 = vmatmul.mubr.bf16.gmra.mrb[84].mxu0 %v953_v50 }
 0x2d9   :  { %1152 = vmatprep.mubr.bf16.mxu0 %v4305_v18 }
 0x2da   :  { %v897_v43 = vadd.f32 %v3581_v21, %v805_v63  ;;  %v2541_v44 = vpop.f32.mrb[28].mxu1  ;;  %v928_v16 = vmax.f32 %v896_v52, 0.0 }
 0x2db   :  { %v2542_v53 = vpop.f32.mrb[29].mxu1 }
 0x2dc   :  { %v929_v24 = vmax.f32 %v897_v43, 0.0  ;;  %v2543_v6 = vadd.f32 %v2542_v53, %v2541_v44  ;;  %v2544_v19 = vpop.f32.mrb[30].mxu1 }
 0x2dd   :  { %v2545_v11 = vpop.f32.mrb[31].mxu1 }
 0x2de   :  { %v810_v2 = vadd.f32 %v2543_v6, %v3435_v7  ;;  %v2546_v35 = vadd.f32 %v2545_v11, %v2544_v19  ;;  %v954_v62 = vpack.c.bf16 %v929_v24, %v928_v16 }
 0x2e0   :  { %v898_v45 = vadd.f32 %v3581_v21, %v810_v2  ;;  %v813_v5 = vadd.f32 %v2546_v35, %v3441_v10  ;;  %1153 = vmatmul.mubr.bf16.gmra.mrb[88].mxu0 %v954_v62 }
 0x2e1   :  { %1162 = vmatprep.mubr.bf16.mxu0 %v4305_v18 }
 0x2e2   :  { %v899_v55 = vadd.f32 %v3581_v21, %v813_v5  ;;  %v2547_v38 = vpop.f32.mrb[32].mxu1  ;;  %v930_v3 = vmax.f32 %v898_v45, 0.0 }
 0x2e3   :  { %v2548_v1 = vpop.f32.mrb[33].mxu1 }
 0x2e4   :  { %v931_v58 = vmax.f32 %v899_v55, 0.0  ;;  %v2549_v48 = vadd.f32 %v2548_v1, %v2547_v38  ;;  %v2550_v0 = vpop.f32.mrb[34].mxu1 }
 0x2e5   :  { %v2551_v61 = vpop.f32.mrb[35].mxu1 }
 0x2e6   :  { %v818_v7 = vadd.f32 %v2549_v48, %v3443_v12  ;;  %v2552_v56 = vadd.f32 %v2551_v61, %v2550_v0  ;;  %v955_v59 = vpack.c.bf16 %v931_v58, %v930_v3 }
 0x2e8   :  { %v900_v33 = vadd.f32 %v3581_v21, %v818_v7  ;;  %v821_v10 = vadd.f32 %v2552_v56, %v3445_v14  ;;  %1163 = vmatmul.mubr.bf16.gmra.mrb[92].mxu0 %v955_v59 }
 0x2e9   :  { %1172 = vmatprep.mubr.bf16.mxu0 %v4305_v18 }
 0x2ea   :  { %v901_v51 = vadd.f32 %v3581_v21, %v821_v10  ;;  %v2553_v40 = vpop.f32.mrb[36].mxu1  ;;  %v932_v47 = vmax.f32 %v900_v33, 0.0 }
 0x2eb   :  { %v2554_v60 = vpop.f32.mrb[37].mxu1 }
 0x2ec   :  { %v933_v50 = vmax.f32 %v901_v51, 0.0  ;;  %v2555_v52 = vadd.f32 %v2554_v60, %v2553_v40  ;;  %v2556_v63 = vpop.f32.mrb[38].mxu1 }
 0x2ed   :  { %v2557_v43 = vpop.f32.mrb[39].mxu1 }
 0x2ee   :  { %v826_v12 = vadd.f32 %v2555_v52, %v3447_v17  ;;  %v2558_v44 = vadd.f32 %v2557_v43, %v2556_v63  ;;  %v956_v53 = vpack.c.bf16 %v933_v50, %v932_v47 }
 0x2f0   :  { %v902_v16 = vadd.f32 %v3581_v21, %v826_v12  ;;  %v829_v14 = vadd.f32 %v2558_v44, %v3449_v20  ;;  %1173 = vmatmul.mubr.bf16.gmra.mrb[96].mxu0 %v956_v53 }
 0x2f1   :  { %1182 = vmatprep.mubr.bf16.mxu0 %v4305_v18 }
 0x2f2   :  { %v903_v24 = vadd.f32 %v3581_v21, %v829_v14  ;;  %v2559_v6 = vpop.f32.mrb[40].mxu1  ;;  %v934_v11 = vmax.f32 %v902_v16, 0.0 }
 0x2f3   :  { %v2560_v19 = vpop.f32.mrb[41].mxu1 }
 0x2f4   :  { %v935_v2 = vmax.f32 %v903_v24, 0.0  ;;  %v2561_v35 = vadd.f32 %v2560_v19, %v2559_v6  ;;  %v2562_v62 = vpop.f32.mrb[42].mxu1 }
 0x2f5   :  { %v2563_v45 = vpop.f32.mrb[43].mxu1 }
 0x2f6   :  { %v834_v17 = vadd.f32 %v2561_v35, %v3451_v22  ;;  %v2564_v5 = vadd.f32 %v2563_v45, %v2562_v62  ;;  %v957_v55 = vpack.c.bf16 %v935_v2, %v934_v11 }
 0x2f8   :  { %v904_v38 = vadd.f32 %v3581_v21, %v834_v17  ;;  %v837_v20 = vadd.f32 %v2564_v5, %v3453_v25  ;;  %1183 = vmatmul.mubr.bf16.gmra.mrb[100].mxu0 %v957_v55 }
 0x2f9   :  { %1192 = vmatprep.mubr.bf16.mxu0 %v4305_v18 }
 0x2fa   :  { %v905_v1 = vadd.f32 %v3581_v21, %v837_v20  ;;  %v2565_v3 = vpop.f32.mrb[44].mxu1  ;;  %v936_v48 = vmax.f32 %v904_v38, 0.0 }
 0x2fb   :  { %v2566_v58 = vpop.f32.mrb[45].mxu1 }
 0x2fc   :  { %v937_v0 = vmax.f32 %v905_v1, 0.0  ;;  %v2567_v61 = vadd.f32 %v2566_v58, %v2565_v3  ;;  %v2568_v7 = vpop.f32.mrb[46].mxu1 }
 0x2fd   :  { %v2569_v56 = vpop.f32.mrb[47].mxu1 }
 0x2fe   :  { %v842_v22 = vadd.f32 %v2567_v61, %v3455_v27  ;;  %v2570_v59 = vadd.f32 %v2569_v56, %v2568_v7  ;;  %v958_v33 = vpack.c.bf16 %v937_v0, %v936_v48 }
 0x300   :  { %v906_v10 = vadd.f32 %v3581_v21, %v842_v22  ;;  %v845_v25 = vadd.f32 %v2570_v59, %v3457_v30  ;;  %1193 = vmatmul.mubr.bf16.gmra.mrb[104].mxu0 %v958_v33 }
 0x301   :  { %1202 = vmatprep.mubr.bf16.mxu0 %v4305_v18 }
 0x302   :  { %v907_v51 = vadd.f32 %v3581_v21, %v845_v25  ;;  %v2571_v40 = vpop.f32.mrb[48].mxu1  ;;  %v938_v47 = vmax.f32 %v906_v10, 0.0 }
 0x303   :  { %v2572_v60 = vpop.f32.mrb[49].mxu1 }
 0x304   :  { %v939_v50 = vmax.f32 %v907_v51, 0.0  ;;  %v2573_v52 = vadd.f32 %v2572_v60, %v2571_v40  ;;  %v2574_v63 = vpop.f32.mrb[50].mxu1 }
 0x305   :  { %v2575_v43 = vpop.f32.mrb[51].mxu1 }
 0x306   :  { %v850_v27 = vadd.f32 %v2573_v52, %v3459_v32  ;;  %v2576_v12 = vadd.f32 %v2575_v43, %v2574_v63  ;;  %v959_v44 = vpack.c.bf16 %v939_v50, %v938_v47 }
 0x308   :  { %v908_v53 = vadd.f32 %v3581_v21, %v850_v27  ;;  %v853_v30 = vadd.f32 %v2576_v12, %v3461_v37  ;;  %1203 = vmatmul.mubr.bf16.gmra.mrb[108].mxu0 %v959_v44 }
 0x309   :  { %1212 = vmatprep.mubr.bf16.mxu0 %v4305_v18 }
 0x30a   :  { %v909_v16 = vadd.f32 %v3581_v21, %v853_v30  ;;  %v2577_v14 = vpop.f32.mrb[52].mxu1  ;;  %v940_v6 = vmax.f32 %v908_v53, 0.0 }
 0x30b   :  { %v2578_v24 = vpop.f32.mrb[53].mxu1 }
 0x30c   :  { %v941_v19 = vmax.f32 %v909_v16, 0.0  ;;  %v2579_v11 = vadd.f32 %v2578_v24, %v2577_v14  ;;  %v2580_v2 = vpop.f32.mrb[54].mxu1 }
 0x30d   :  { %v2581_v35 = vpop.f32.mrb[55].mxu1 }
 0x30e   :  { %v858_v32 = vadd.f32 %v2579_v11, %v3463_v41  ;;  %v2582_v62 = vadd.f32 %v2581_v35, %v2580_v2  ;;  %v960_v45 = vpack.c.bf16 %v941_v19, %v940_v6 }
 0x310   :  { %v910_v17 = vadd.f32 %v3581_v21, %v858_v32  ;;  %v861_v37 = vadd.f32 %v2582_v62, %v3465_v46  ;;  %1213 = vmatmul.mubr.bf16.gmra.mrb[112].mxu0 %v960_v45 }
 0x311   :  { %1222 = vmatprep.mubr.bf16.mxu0 %v4305_v18 }
 0x312   :  { %v911_v5 = vadd.f32 %v3581_v21, %v861_v37  ;;  %v2583_v55 = vpop.f32.mrb[56].mxu1  ;;  %v942_v20 = vmax.f32 %v910_v17, 0.0 }
 0x313   :  { %v2584_v38 = vpop.f32.mrb[57].mxu1 }
 0x314   :  { %v943_v1 = vmax.f32 %v911_v5, 0.0  ;;  %v2585_v3 = vadd.f32 %v2584_v38, %v2583_v55  ;;  %v2586_v58 = vpop.f32.mrb[58].mxu1 }
 0x315   :  { %v2587_v48 = vpop.f32.mrb[59].mxu1 }
 0x316   :  { %v866_v41 = vadd.f32 %v2585_v3, %v3467_v49  ;;  %v2588_v0 = vadd.f32 %v2587_v48, %v2586_v58  ;;  %v961_v61 = vpack.c.bf16 %v943_v1, %v942_v20 }
 0x318   :  { %v912_v7 = vadd.f32 %v3581_v21, %v866_v41  ;;  %v869_v46 = vadd.f32 %v2588_v0, %v3469_v54  ;;  %1223 = vmatmul.mubr.bf16.gmra.mrb[116].mxu0 %v961_v61 }
 0x319   :  { %1232 = vmatprep.mubr.bf16.mxu0 %v4305_v18 }
 0x31a   :  { %v913_v56 = vadd.f32 %v3581_v21, %v869_v46  ;;  %v2589_v22 = vpop.f32.mrb[60].mxu1  ;;  %v944_v33 = vmax.f32 %v912_v7, 0.0 }
 0x31b   :  { %v2590_v59 = vpop.f32.mrb[61].mxu1 }
 0x31c   :  { %v945_v10 = vmax.f32 %v913_v56, 0.0  ;;  %v2591_v25 = vadd.f32 %v2590_v59, %v2589_v22  ;;  %v2592_v51 = vpop.f32.mrb[62].mxu1 }
 0x31d   :  { %v2593_v40 = vpop.f32.mrb[63].mxu1 }
 0x31e   :  { %v874_v49 = vadd.f32 %v2591_v25, %v3471_v57  ;;  %v2594_v60 = vadd.f32 %v2593_v40, %v2592_v51  ;;  %v962_v47 = vpack.c.bf16 %v945_v10, %v944_v33 }
 0x320   :  { %v914_v50 = vadd.f32 %v3581_v21, %v874_v49  ;;  %v877_v54 = vadd.f32 %v2594_v60, %v3473_v13  ;;  %1233 = vmatmul.mubr.bf16.gmra.mrb[120].mxu0 %v962_v47 }
 0x321   :  { %1242 = vmatprep.mubr.bf16.mxu0 %v4305_v18 }
 0x322   :  { %v915_v52 = vadd.f32 %v3581_v21, %v877_v54  ;;  %v946_v63 = vmax.f32 %v914_v50, 0.0 }
 0x324   :  { %v947_v43 = vmax.f32 %v915_v52, 0.0 }
 0x326   :  { %v963_v27 = vpack.c.bf16 %v947_v43, %v946_v63 }
 0x328   :  { %1243 = vmatmul.mubr.bf16.gmra.mrb[124].mxu0 %v963_v27 }
 0x329   :  { %1642 = vmatprep.mubr.bf16.mxu0 %v4305_v18 }
 0x383   :  { %v1094_v12 = vpop.f32.mrb[64].mxu0 }
 0x384   :  { %v3663_v44 = vpop.f32.mrb[65].mxu0 }
 0x385   :  { %v1098_v57 = vpop.f32.mrb[66].mxu0 }
 0x386   :  { %v1253_v53 = vpack.c.bf16 %v1098_v57, %v1094_v12  ;;  %v3665_v30 = vpop.f32.mrb[67].mxu0 }
 0x38b   :  { %v1104_v16 = vpop.f32.mrb[68].mxu0 }
 0x38c   :  { %v3667_v13 = vpop.f32.mrb[69].mxu0 }
 0x38d   :  { %v1108_v14 = vpop.f32.mrb[70].mxu0 }
 0x38e   :  { %v1254_v24 = vpack.c.bf16 %v1108_v14, %v1104_v16  ;;  %v3669_v6 = vpop.f32.mrb[71].mxu0 }
 0x393   :  { %v1114_v21 = vpop.f32.mrb[72].mxu0 }
 0x394   :  { %v3671_v19 = vpop.f32.mrb[73].mxu0 }
 0x395   :  { %v1118_v11 = vpop.f32.mrb[74].mxu0 }
 0x396   :  { %v1255_v2 = vpack.c.bf16 %v1118_v11, %v1114_v21  ;;  %v3673_v35 = vpop.f32.mrb[75].mxu0 }
 0x39b   :  { %v1124_v32 = vpop.f32.mrb[76].mxu0 }
 0x39c   :  { %v3675_v62 = vpop.f32.mrb[77].mxu0 }
 0x39d   :  { %v1128_v45 = vpop.f32.mrb[78].mxu0 }
 0x39e   :  { %v1256_v17 = vpack.c.bf16 %v1128_v45, %v1124_v32  ;;  %v3677_v37 = vpop.f32.mrb[79].mxu0 }
 0x3a3   :  { %v1134_v5 = vpop.f32.mrb[80].mxu0 }
 0x3a4   :  { %v3679_v55 = vpop.f32.mrb[81].mxu0 }
 0x3a5   :  { %v1138_v38 = vpop.f32.mrb[82].mxu0 }
 0x3a6   :  { %v1257_v20 = vpack.c.bf16 %v1138_v38, %v1134_v5  ;;  %v3681_v1 = vpop.f32.mrb[83].mxu0 }
 0x3ab   :  { %v1144_v3 = vpop.f32.mrb[84].mxu0 }
 0x3ac   :  { %v3683_v58 = vpop.f32.mrb[85].mxu0 }
 0x3ad   :  { %v1148_v48 = vpop.f32.mrb[86].mxu0 }
 0x3ae   :  { %v1258_v41 = vpack.c.bf16 %v1148_v48, %v1144_v3  ;;  %v3685_v0 = vpop.f32.mrb[87].mxu0 }
 0x3b3   :  { %v1154_v61 = vpop.f32.mrb[88].mxu0 }
 0x3b4   :  { %v3687_v7 = vpop.f32.mrb[89].mxu0 }
 0x3b5   :  { %v1158_v46 = vpop.f32.mrb[90].mxu0 }
 0x3b6   :  { %v1259_v56 = vpack.c.bf16 %v1158_v46, %v1154_v61  ;;  %v3689_v22 = vpop.f32.mrb[91].mxu0 }
 0x3bb   :  { %v3691_v59 = vpop.f32.mrb[92].mxu0 }
 0x3bc   :  { %v3693_v33 = vpop.f32.mrb[93].mxu0 }
 0x3bd   :  { %v3695_v10 = vpop.f32.mrb[94].mxu0 }
 0x3be   :  { %v1260_v25 = vpack.c.bf16 %v3695_v10, %v3691_v59  ;;  %v3699_v51 = vpop.f32.mrb[95].mxu0  ;;  %v2960_v59 = vld [vmem:[#allocation10 + $0x60] ss:$8 sps:$4 sm:$0xff]   ;;  %v4316_v10 = vld [vmem:[#allocation26_spill] sm:$0xff] }
 0x3c3   :  { %v1174_v40 = vpop.f32.mrb[96].mxu0 }
 0x3c4   :  { %v3701_v49 = vpop.f32.mrb[97].mxu0 }
 0x3c5   :  { %v1178_v60 = vpop.f32.mrb[98].mxu0 }
 0x3c6   :  { %v1261_v47 = vpack.c.bf16 %v1178_v60, %v1174_v40  ;;  %v3703_v50 = vpop.f32.mrb[99].mxu0 }
 0x3c8   :  { %2595 = vmatprep.subr.bf16.mxu1 %v1261_v47 }
 0x3c9   :  { %2596 = vmatpush3.bf16.msra.mxu1 %v1253_v53 }
 0x3cb   :  { %v1184_v54 = vpop.f32.mrb[100].mxu0 }
 0x3cc   :  { %v3705_v52 = vpop.f32.mrb[101].mxu0 }
 0x3cd   :  { %v1188_v63 = vpop.f32.mrb[102].mxu0 }
 0x3ce   :  { %v1262_v43 = vpack.c.bf16 %v1188_v63, %v1184_v54  ;;  %v3707_v27 = vpop.f32.mrb[103].mxu0 }
 0x3d0   :  { %2597 = vmatprep.subr.bf16.mxu1 %v1262_v43 }
 0x3d1   :  { %2598 = vmatpush3.bf16.msra.mxu1 %v1254_v24 }
 0x3d3   :  { %v1194_v12 = vpop.f32.mrb[104].mxu0 }
 0x3d4   :  { %v3709_v57 = vpop.f32.mrb[105].mxu0 }
 0x3d5   :  { %v1198_v16 = vpop.f32.mrb[106].mxu0 }
 0x3d6   :  { %v1263_v14 = vpack.c.bf16 %v1198_v16, %v1194_v12  ;;  %v3711_v21 = vpop.f32.mrb[107].mxu0 }
 0x3d8   :  { %2599 = vmatprep.subr.bf16.mxu1 %v1263_v14  ;;  %v2942_v14 = vld [vmem:[#allocation10] ss:$8 sps:$4 sm:$0xff]  }
 0x3d9   :  { %2600 = vmatpush3.bf16.msra.mxu1 %v1255_v2 }
 0x3db   :  { %v1204_v11 = vpop.f32.mrb[108].mxu0 }
 0x3dc   :  { %v3713_v53 = vpop.f32.mrb[109].mxu0 }
 0x3dd   :  { %v1208_v32 = vpop.f32.mrb[110].mxu0 }
 0x3de   :  { %v1264_v45 = vpack.c.bf16 %v1208_v32, %v1204_v11  ;;  %v3715_v5 = vpop.f32.mrb[111].mxu0  ;;  %v2944_v11 = vld [vmem:[#allocation10 + $0x4] ss:$8 sps:$4 sm:$0xff]  }
 0x3df   :  { %1610 = vmatprep.subr.bf16.mxu0 %v2944_v11  ;;  %v4320_v11 = vld [vmem:[#allocation30_spill] sm:$0xff] }
 0x3e0   :  { %2601 = vmatprep.subr.bf16.mxu1 %v1264_v45  ;;  %v2947_v45 = vld [vmem:[#allocation10 + $0x14] ss:$8 sps:$4 sm:$0xff]   ;;  %1611 = vmatpush1.bf16.msra.mxu0 %v2942_v14  ;;  %v4319_v14 = vld [vmem:[#allocation29_spill] sm:$0xff] }
 0x3e1   :  { %2602 = vmatpush3.bf16.msra.mxu1 %v1256_v17  ;;  %1612 = vmatprep.subr.bf16.mxu0 %v2947_v45  ;;  %v4322_v45 = vld [vmem:[#allocation32_spill] sm:$0xff] }
 0x3e3   :  { %v1214_v38 = vpop.f32.mrb[112].mxu0 }
 0x3e4   :  { %v3717_v24 = vpop.f32.mrb[113].mxu0 }
 0x3e5   :  { %v1218_v3 = vpop.f32.mrb[114].mxu0 }
 0x3e6   :  { %v1265_v48 = vpack.c.bf16 %v1218_v3, %v1214_v38  ;;  %v3719_v61 = vpop.f32.mrb[115].mxu0 }
 0x3e8   :  { %2603 = vmatprep.subr.bf16.mxu1 %v1265_v48  ;;  %v2950_v48 = vld [vmem:[#allocation10 + $0x24] ss:$8 sps:$4 sm:$0xff]  }
 0x3e9   :  { %2604 = vmatpush3.bf16.msra.mxu1 %v1257_v20 }
 0x3eb   :  { %v1224_v46 = vpop.f32.mrb[116].mxu0 }
 0x3ec   :  { %v3721_v2 = vpop.f32.mrb[117].mxu0 }
 0x3ed   :  { %v1228_v40 = vpop.f32.mrb[118].mxu0 }
 0x3ee   :  { %v1266_v60 = vpack.c.bf16 %v1228_v40, %v1224_v46  ;;  %v3723_v47 = vpop.f32.mrb[119].mxu0  ;;  %v2953_v46 = vld [vmem:[#allocation10 + $0x34] ss:$8 sps:$4 sm:$0xff]   ;;  %v2951_v40 = vld [vmem:[#allocation10 + $0x30] ss:$8 sps:$4 sm:$0xff]  }
 0x3f0   :  { %2605 = vmatprep.subr.bf16.mxu1 %v1266_v60  ;;  %v2956_v60 = vld [vmem:[#allocation10 + $0x44] ss:$8 sps:$4 sm:$0xff]  }
 0x3f1   :  { %2606 = vmatpush3.bf16.msra.mxu1 %v1258_v41  ;;  %v2945_v41 = vld [vmem:[#allocation10 + $0x10] ss:$8 sps:$4 sm:$0xff]  }
 0x3f2   :  { %1613 = vmatpush1.bf16.msra.mxu0 %v2945_v41  ;;  %v3094_v41 = vld [vmem:[#allocation2 + $0x4] ss:$8 sps:$4 sm:$0xff]  }
 0x3f3   :  { %v1234_v54 = vpop.f32.mrb[120].mxu0  ;;  %1614 = vmatprep.subr.bf16.mxu0 %v2950_v48  ;;  %v4324_v48 = vld [vmem:[#allocation34_spill] sm:$0xff] }
 0x3f4   :  { %v3725_v17 = vpop.f32.mrb[121].mxu0 }
 0x3f5   :  { %v1238_v63 = vpop.f32.mrb[122].mxu0 }
 0x3f6   :  { %v1267_v43 = vpack.c.bf16 %v1238_v63, %v1234_v54  ;;  %v3727_v12 = vpop.f32.mrb[123].mxu0  ;;  %v2954_v54 = vld [vmem:[#allocation10 + $0x40] ss:$8 sps:$4 sm:$0xff]   ;;  %v2963_v63 = vld [vmem:[#allocation10 + $0x70] ss:$8 sps:$4 sm:$0xff]  }
 0x3f8   :  { %2607 = vmatprep.subr.bf16.mxu1 %v1267_v43  ;;  %v4317_v43 = vld [vmem:[#allocation27_spill] sm:$0xff] }
 0x3f9   :  { %2608 = vmatpush3.bf16.msra.mxu1 %v1259_v56  ;;  %v2948_v56 = vld [vmem:[#allocation10 + $0x20] ss:$8 sps:$4 sm:$0xff]  }
 0x3fa   :  { %1615 = vmatpush1.bf16.msra.mxu0 %v2948_v56  ;;  %v1432_v56 = vsub.s32 1, %v4324_v48 }
 0x3fb   :  { %v1244_v16 = vpop.f32.mrb[124].mxu0  ;;  %1616 = vmatprep.subr.bf16.mxu0 %v2953_v46 }
 0x3fc   :  { %v3729_v20 = vpop.f32.mrb[125].mxu0 }
 0x3fd   :  { %v1248_v32 = vpop.f32.mrb[126].mxu0 }
 0x3fe   :  { %v1268_v38 = vpack.c.bf16 %v1248_v32, %v1244_v16  ;;  %v3731_v3 = vpop.f32.mrb[127].mxu0  ;;  %1617 = vmatpush1.bf16.msra.mxu0 %v2951_v40  ;;  %v4318_v16 = vld [vmem:[#allocation28_spill] sm:$0xff]  ;;  %v4321_v32 = vld [vmem:[#allocation31_spill] sm:$0xff] }
 0x3ff   :  { %1618 = vmatprep.subr.bf16.mxu0 %v2956_v60 }
 0x400   :  { %2609 = vmatprep.subr.bf16.mxu1 %v1268_v38  ;;  %v4323_v38 = vld [vmem:[#allocation33_spill] sm:$0xff] }
 0x401   :  { %2610 = vmatpush3.bf16.msra.mxu1 %v1260_v25  ;;  %v2965_v25 = vld [vmem:[#allocation10 + $0x74] ss:$8 sps:$4 sm:$0xff]  }
 0x402   :  { %1619 = vmatpush1.bf16.msra.mxu0 %v2954_v54  ;;  %v4325_v54 = vld [vmem:[#allocation35_spill] sm:$0xff] }
 0x404   :  { %1302 = vmatmul.mubr.bf16.vlgmr.msra.gmra.mrb[64].mxu1 %v3475_v15  ;;  %v4306_v15 = vld [vmem:[#allocation16_spill] sm:$0xff] }
 0x405   :  { %1309 = vmatprep.mubr.bf16.mxu1 %v3480_v4  ;;  %v4307_v4 = vld [vmem:[#allocation17_spill] sm:$0xff] }
 0x40c   :  { %1310 = vmatmul.mubr.bf16.gmra.mrb[68].mxu1 %v3484_v23  ;;  %v4308_v23 = vld [vmem:[#allocation18_spill] sm:$0xff] }
 0x40d   :  { %1317 = vmatprep.mubr.bf16.mxu1 %v3486_v26  ;;  %v4309_v26 = vld [vmem:[#allocation19_spill] sm:$0xff] }
 0x414   :  { %1318 = vmatmul.mubr.bf16.gmra.mrb[72].mxu1 %v3490_v8  ;;  %v4310_v8 = vld [vmem:[#allocation20_spill] sm:$0xff] }
 0x415   :  { %1325 = vmatprep.mubr.bf16.mxu1 %v3492_v9  ;;  %v4311_v9 = vld [vmem:[#allocation21_spill] sm:$0xff] }
 0x41c   :  { %1326 = vmatmul.mubr.bf16.gmra.mrb[76].mxu1 %v3496_v28  ;;  %v4312_v28 = vld [vmem:[#allocation22_spill] sm:$0xff] }
 0x41d   :  { %1333 = vmatprep.mubr.bf16.mxu1 %v3498_v29  ;;  %v4313_v29 = vld [vmem:[#allocation23_spill] sm:$0xff] }
 0x424   :  { %1334 = vmatmul.mubr.bf16.gmra.mrb[80].mxu1 %v3502_v31  ;;  %v4314_v31 = vld [vmem:[#allocation24_spill] sm:$0xff] }
 0x425   :  { %1341 = vmatprep.mubr.bf16.mxu1 %v3504_v34  ;;  %v2959_v34 = vld [vmem:[#allocation10 + $0x54] ss:$8 sps:$4 sm:$0xff]  }
 0x426   :  { %1620 = vmatprep.subr.bf16.mxu0 %v2959_v34 }
 0x42c   :  { %1342 = vmatmul.mubr.bf16.gmra.mrb[84].mxu1 %v3508_v36  ;;  %v2957_v36 = vld [vmem:[#allocation10 + $0x50] ss:$8 sps:$4 sm:$0xff]  }
 0x42d   :  { %1349 = vmatprep.mubr.bf16.mxu1 %v3510_v39  ;;  %1621 = vmatpush1.bf16.msra.mxu0 %v2957_v36  ;;  %v2962_v39 = vld [vmem:[#allocation10 + $0x64] ss:$8 sps:$4 sm:$0xff]  }
 0x42e   :  { %1622 = vmatprep.subr.bf16.mxu0 %v2962_v39 }
 0x431   :  { %1623 = vmatpush1.bf16.msra.mxu0 %v2960_v59 }
 0x432   :  { %1624 = vmatprep.subr.bf16.mxu0 %v2965_v25 }
 0x434   :  { %1350 = vmatmul.mubr.bf16.gmra.mrb[88].mxu1 %v3514_v42  ;;  %v4315_v42 = vld [vmem:[#allocation25_spill] sm:$0xff] }
 0x435   :  { %1357 = vmatprep.mubr.bf16.mxu1 %v4306_v15  ;;  %1625 = vmatpush1.bf16.msra.mxu0 %v2963_v63  ;;  %v3769_v15 = vrot.slane %v4325_v54, %v1432_v56 }
 0x43c   :  { %1358 = vmatmul.mubr.bf16.gmra.mrb[92].mxu1 %v4307_v4 }
 0x43d   :  { %1365 = vmatprep.mubr.bf16.mxu1 %v4308_v23 }
 0x444   :  { %1366 = vmatmul.mubr.bf16.gmra.mrb[96].mxu1 %v4309_v26 }
 0x445   :  { %1373 = vmatprep.mubr.bf16.mxu1 %v4310_v8 }
 0x44c   :  { %1374 = vmatmul.mubr.bf16.gmra.mrb[100].mxu1 %v4311_v9 }
 0x44d   :  { %1381 = vmatprep.mubr.bf16.mxu1 %v4312_v28 }
 0x454   :  { %1382 = vmatmul.mubr.bf16.gmra.mrb[104].mxu1 %v4313_v29 }
 0x455   :  { %1389 = vmatprep.mubr.bf16.mxu1 %v4314_v31 }
 0x45c   :  { %1390 = vmatmul.mubr.bf16.gmra.mrb[108].mxu1 %v4315_v42 }
 0x45d   :  { %1397 = vmatprep.mubr.bf16.mxu1 %v4316_v10 }
 0x464   :  { %1398 = vmatmul.mubr.bf16.gmra.mrb[112].mxu1 %v4317_v43 }
 0x465   :  { %1405 = vmatprep.mubr.bf16.mxu1 %v4318_v16 }
 0x46c   :  { %1406 = vmatmul.mubr.bf16.gmra.mrb[116].mxu1 %v4319_v14 }
 0x46d   :  { %1413 = vmatprep.mubr.bf16.mxu1 %v4320_v11 }
 0x474   :  { %1414 = vmatmul.mubr.bf16.gmra.mrb[120].mxu1 %v4321_v32 }
 0x475   :  { %1421 = vmatprep.mubr.bf16.mxu1 %v4322_v45 }
 0x47c   :  { %1422 = vmatmul.mubr.bf16.gmra.mrb[124].mxu1 %v4323_v38 }
 0x47d   :  { %1851 = vmatprep.mubr.bf16.mxu1 %v3094_v41 }
 0x4d7   :  { %v2611_v46 = vpop.f32.mrb[64].mxu1 }
 0x4d8   :  { %v2612_v40 = vpop.f32.mrb[65].mxu1 }
 0x4d9   :  { %v2613_v60 = vadd.f32 %v2612_v40, %v2611_v46  ;;  %v2614_v4 = vpop.f32.mrb[66].mxu1 }
 0x4da   :  { %v2615_v23 = vpop.f32.mrb[67].mxu1 }
 0x4db   :  { %v1304_v26 = vadd.f32 %v2613_v60, %v3663_v44  ;;  %v2616_v8 = vadd.f32 %v2615_v23, %v2614_v4 }
 0x4dd   :  { %v1434_v9 = vadd.f32 %v3769_v15, %v1304_v26  ;;  %v1307_v28 = vadd.f32 %v2616_v8, %v3665_v30 }
 0x4df   :  { %v1435_v29 = vadd.f32 %v3769_v15, %v1307_v28  ;;  %v2617_v31 = vpop.f32.mrb[68].mxu1  ;;  %v1466_v36 = vmax.f32 %v1434_v9, 0.0 }
 0x4e0   :  { %v2618_v34 = vpop.f32.mrb[69].mxu1 }
 0x4e1   :  { %v1467_v39 = vmax.f32 %v1435_v29, 0.0  ;;  %v2619_v42 = vadd.f32 %v2618_v34, %v2617_v31  ;;  %v2620_v59 = vpop.f32.mrb[70].mxu1 }
 0x4e2   :  { %v2621_v10 = vpop.f32.mrb[71].mxu1 }
 0x4e3   :  { %v1498_v25 = vpack.c.bf16 %v1467_v39, %v1466_v36  ;;  %v1312_v63 = vadd.f32 %v2619_v42, %v3667_v13  ;;  %v2622_v43 = vadd.f32 %v2621_v10, %v2620_v59 }
 0x4e5   :  { %v1436_v44 = vadd.f32 %v3769_v15, %v1312_v63  ;;  %v1315_v16 = vadd.f32 %v2622_v43, %v3669_v6  ;;  %1643 = vmatmul.mubr.bf16.vlgmr.msra.gmra.mrb[128].mxu0 %v1498_v25 }
 0x4e6   :  { %1652 = vmatprep.mubr.bf16.mxu0 %v4305_v18 }
 0x4e7   :  { %v1437_v30 = vadd.f32 %v3769_v15, %v1315_v16  ;;  %v2623_v14 = vpop.f32.mrb[72].mxu1  ;;  %v1468_v32 = vmax.f32 %v1436_v44, 0.0 }
 0x4e8   :  { %v2624_v11 = vpop.f32.mrb[73].mxu1 }
 0x4e9   :  { %v1469_v45 = vmax.f32 %v1437_v30, 0.0  ;;  %v2625_v38 = vadd.f32 %v2624_v11, %v2623_v14  ;;  %v2626_v41 = vpop.f32.mrb[74].mxu1 }
 0x4ea   :  { %v2627_v56 = vpop.f32.mrb[75].mxu1 }
 0x4eb   :  { %v1320_v46 = vadd.f32 %v2625_v38, %v3671_v19  ;;  %v2628_v13 = vadd.f32 %v2627_v56, %v2626_v41  ;;  %v1499_v40 = vpack.c.bf16 %v1469_v45, %v1468_v32 }
 0x4ed   :  { %v1438_v60 = vadd.f32 %v3769_v15, %v1320_v46  ;;  %v1323_v6 = vadd.f32 %v2628_v13, %v3673_v35  ;;  %1653 = vmatmul.mubr.bf16.gmra.mrb[132].mxu0 %v1499_v40 }
 0x4ee   :  { %1662 = vmatprep.mubr.bf16.mxu0 %v4305_v18 }
 0x4ef   :  { %v1439_v54 = vadd.f32 %v3769_v15, %v1323_v6  ;;  %v2629_v4 = vpop.f32.mrb[76].mxu1  ;;  %v1470_v26 = vmax.f32 %v1438_v60, 0.0 }
 0x4f0   :  { %v2630_v23 = vpop.f32.mrb[77].mxu1 }
 0x4f1   :  { %v1471_v8 = vmax.f32 %v1439_v54, 0.0  ;;  %v2631_v9 = vadd.f32 %v2630_v23, %v2629_v4  ;;  %v2632_v28 = vpop.f32.mrb[78].mxu1 }
 0x4f2   :  { %v2633_v29 = vpop.f32.mrb[79].mxu1 }
 0x4f3   :  { %v1328_v19 = vadd.f32 %v2631_v9, %v3675_v62  ;;  %v2634_v31 = vadd.f32 %v2633_v29, %v2632_v28  ;;  %v1500_v34 = vpack.c.bf16 %v1471_v8, %v1470_v26 }
 0x4f5   :  { %v1440_v36 = vadd.f32 %v3769_v15, %v1328_v19  ;;  %v1331_v35 = vadd.f32 %v2634_v31, %v3677_v37  ;;  %1663 = vmatmul.mubr.bf16.gmra.mrb[136].mxu0 %v1500_v34 }
 0x4f6   :  { %1672 = vmatprep.mubr.bf16.mxu0 %v4305_v18 }
 0x4f7   :  { %v1441_v39 = vadd.f32 %v3769_v15, %v1331_v35  ;;  %v2635_v42 = vpop.f32.mrb[80].mxu1  ;;  %v1472_v10 = vmax.f32 %v1440_v36, 0.0 }
 0x4f8   :  { %v2636_v59 = vpop.f32.mrb[81].mxu1 }
 0x4f9   :  { %v1473_v25 = vmax.f32 %v1441_v39, 0.0  ;;  %v2637_v63 = vadd.f32 %v2636_v59, %v2635_v42  ;;  %v2638_v43 = vpop.f32.mrb[82].mxu1 }
 0x4fa   :  { %v2639_v44 = vpop.f32.mrb[83].mxu1 }
 0x4fb   :  { %v1336_v62 = vadd.f32 %v2637_v63, %v3679_v55  ;;  %v2640_v16 = vadd.f32 %v2639_v44, %v2638_v43  ;;  %v1501_v30 = vpack.c.bf16 %v1473_v25, %v1472_v10 }
 0x4fd   :  { %v1442_v14 = vadd.f32 %v3769_v15, %v1336_v62  ;;  %v1339_v37 = vadd.f32 %v2640_v16, %v3681_v1  ;;  %1673 = vmatmul.mubr.bf16.gmra.mrb[140].mxu0 %v1501_v30 }
 0x4fe   :  { %1682 = vmatprep.mubr.bf16.mxu0 %v4305_v18 }
 0x4ff   :  { %v1443_v11 = vadd.f32 %v3769_v15, %v1339_v37  ;;  %v2641_v32 = vpop.f32.mrb[84].mxu1  ;;  %v1474_v38 = vmax.f32 %v1442_v14, 0.0 }
 0x500   :  { %v2642_v45 = vpop.f32.mrb[85].mxu1 }
 0x501   :  { %v1475_v41 = vmax.f32 %v1443_v11, 0.0  ;;  %v2643_v56 = vadd.f32 %v2642_v45, %v2641_v32  ;;  %v2644_v46 = vpop.f32.mrb[86].mxu1 }
 0x502   :  { %v2645_v13 = vpop.f32.mrb[87].mxu1 }
 0x503   :  { %v1344_v55 = vadd.f32 %v2643_v56, %v3683_v58  ;;  %v2646_v40 = vadd.f32 %v2645_v13, %v2644_v46  ;;  %v1502_v60 = vpack.c.bf16 %v1475_v41, %v1474_v38 }
 0x505   :  { %v1444_v6 = vadd.f32 %v3769_v15, %v1344_v55  ;;  %v1347_v1 = vadd.f32 %v2646_v40, %v3685_v0  ;;  %1683 = vmatmul.mubr.bf16.gmra.mrb[144].mxu0 %v1502_v60 }
 0x506   :  { %1692 = vmatprep.mubr.bf16.mxu0 %v4305_v18 }
 0x507   :  { %v1445_v54 = vadd.f32 %v3769_v15, %v1347_v1  ;;  %v2647_v4 = vpop.f32.mrb[88].mxu1  ;;  %v1476_v26 = vmax.f32 %v1444_v6, 0.0 }
 0x508   :  { %v2648_v23 = vpop.f32.mrb[89].mxu1 }
 0x509   :  { %v1477_v8 = vmax.f32 %v1445_v54, 0.0  ;;  %v2649_v9 = vadd.f32 %v2648_v23, %v2647_v4  ;;  %v2650_v28 = vpop.f32.mrb[90].mxu1 }
 0x50a   :  { %v2651_v29 = vpop.f32.mrb[91].mxu1 }
 0x50b   :  { %v1352_v58 = vadd.f32 %v2649_v9, %v3687_v7  ;;  %v2652_v19 = vadd.f32 %v2651_v29, %v2650_v28  ;;  %v1503_v31 = vpack.c.bf16 %v1477_v8, %v1476_v26 }
 0x50d   :  { %v1446_v34 = vadd.f32 %v3769_v15, %v1352_v58  ;;  %v1355_v0 = vadd.f32 %v2652_v19, %v3689_v22  ;;  %1693 = vmatmul.mubr.bf16.gmra.mrb[148].mxu0 %v1503_v31 }
 0x50e   :  { %1702 = vmatprep.mubr.bf16.mxu0 %v4305_v18 }
 0x50f   :  { %v1447_v36 = vadd.f32 %v3769_v15, %v1355_v0  ;;  %v2653_v35 = vpop.f32.mrb[92].mxu1  ;;  %v1478_v42 = vmax.f32 %v1446_v34, 0.0 }
 0x510   :  { %v2654_v39 = vpop.f32.mrb[93].mxu1 }
 0x511   :  { %v1479_v59 = vmax.f32 %v1447_v36, 0.0  ;;  %v2655_v10 = vadd.f32 %v2654_v39, %v2653_v35  ;;  %v2656_v25 = vpop.f32.mrb[94].mxu1 }
 0x512   :  { %v2657_v63 = vpop.f32.mrb[95].mxu1 }
 0x513   :  { %v1360_v7 = vadd.f32 %v2655_v10, %v3693_v33  ;;  %v2658_v43 = vadd.f32 %v2657_v63, %v2656_v25  ;;  %v1504_v44 = vpack.c.bf16 %v1479_v59, %v1478_v42 }
 0x515   :  { %v1448_v62 = vadd.f32 %v3769_v15, %v1360_v7  ;;  %v1363_v22 = vadd.f32 %v2658_v43, %v3699_v51  ;;  %1703 = vmatmul.mubr.bf16.gmra.mrb[152].mxu0 %v1504_v44 }
 0x516   :  { %1712 = vmatprep.mubr.bf16.mxu0 %v4305_v18 }
 0x517   :  { %v1449_v16 = vadd.f32 %v3769_v15, %v1363_v22  ;;  %v2659_v30 = vpop.f32.mrb[96].mxu1  ;;  %v1480_v37 = vmax.f32 %v1448_v62, 0.0 }
 0x518   :  { %v2660_v14 = vpop.f32.mrb[97].mxu1 }
 0x519   :  { %v1481_v11 = vmax.f32 %v1449_v16, 0.0  ;;  %v2661_v32 = vadd.f32 %v2660_v14, %v2659_v30  ;;  %v2662_v45 = vpop.f32.mrb[98].mxu1 }
 0x51a   :  { %v2663_v38 = vpop.f32.mrb[99].mxu1 }
 0x51b   :  { %v1368_v33 = vadd.f32 %v2661_v32, %v3701_v49  ;;  %v2664_v41 = vadd.f32 %v2663_v38, %v2662_v45  ;;  %v1505_v56 = vpack.c.bf16 %v1481_v11, %v1480_v37 }
 0x51d   :  { %v1450_v46 = vadd.f32 %v3769_v15, %v1368_v33  ;;  %v1371_v51 = vadd.f32 %v2664_v41, %v3703_v50  ;;  %1713 = vmatmul.mubr.bf16.gmra.mrb[156].mxu0 %v1505_v56 }
 0x51e   :  { %1722 = vmatprep.mubr.bf16.mxu0 %v4305_v18 }
 0x51f   :  { %v1451_v13 = vadd.f32 %v3769_v15, %v1371_v51  ;;  %v2665_v55 = vpop.f32.mrb[100].mxu1  ;;  %v1482_v60 = vmax.f32 %v1450_v46, 0.0 }
 0x520   :  { %v2666_v40 = vpop.f32.mrb[101].mxu1 }
 0x521   :  { %v1483_v6 = vmax.f32 %v1451_v13, 0.0  ;;  %v2667_v1 = vadd.f32 %v2666_v40, %v2665_v55  ;;  %v2668_v54 = vpop.f32.mrb[102].mxu1 }
 0x522   :  { %v2669_v4 = vpop.f32.mrb[103].mxu1 }
 0x523   :  { %v1376_v49 = vadd.f32 %v2667_v1, %v3705_v52  ;;  %v2670_v23 = vadd.f32 %v2669_v4, %v2668_v54  ;;  %v1506_v26 = vpack.c.bf16 %v1483_v6, %v1482_v60 }
 0x525   :  { %v1452_v8 = vadd.f32 %v3769_v15, %v1376_v49  ;;  %v1379_v50 = vadd.f32 %v2670_v23, %v3707_v27  ;;  %1723 = vmatmul.mubr.bf16.gmra.mrb[160].mxu0 %v1506_v26 }
 0x526   :  { %1732 = vmatprep.mubr.bf16.mxu0 %v4305_v18 }
 0x527   :  { %v1453_v9 = vadd.f32 %v3769_v15, %v1379_v50  ;;  %v2671_v28 = vpop.f32.mrb[104].mxu1  ;;  %v1484_v58 = vmax.f32 %v1452_v8, 0.0 }
 0x528   :  { %v2672_v29 = vpop.f32.mrb[105].mxu1 }
 0x529   :  { %v1485_v19 = vmax.f32 %v1453_v9, 0.0  ;;  %v2673_v31 = vadd.f32 %v2672_v29, %v2671_v28  ;;  %v2674_v34 = vpop.f32.mrb[106].mxu1 }
 0x52a   :  { %v2675_v0 = vpop.f32.mrb[107].mxu1 }
 0x52b   :  { %v1384_v52 = vadd.f32 %v2673_v31, %v3709_v57  ;;  %v2676_v36 = vadd.f32 %v2675_v0, %v2674_v34  ;;  %v1507_v35 = vpack.c.bf16 %v1485_v19, %v1484_v58 }
 0x52d   :  { %v1454_v39 = vadd.f32 %v3769_v15, %v1384_v52  ;;  %v1387_v27 = vadd.f32 %v2676_v36, %v3711_v21  ;;  %1733 = vmatmul.mubr.bf16.gmra.mrb[164].mxu0 %v1507_v35 }
 0x52e   :  { %1742 = vmatprep.mubr.bf16.mxu0 %v4305_v18 }
 0x52f   :  { %v1455_v42 = vadd.f32 %v3769_v15, %v1387_v27  ;;  %v2677_v59 = vpop.f32.mrb[108].mxu1  ;;  %v1486_v25 = vmax.f32 %v1454_v39, 0.0 }
 0x530   :  { %v2678_v10 = vpop.f32.mrb[109].mxu1 }
 0x531   :  { %v1487_v63 = vmax.f32 %v1455_v42, 0.0  ;;  %v2679_v7 = vadd.f32 %v2678_v10, %v2677_v59  ;;  %v2680_v43 = vpop.f32.mrb[110].mxu1 }
 0x532   :  { %v2681_v44 = vpop.f32.mrb[111].mxu1 }
 0x533   :  { %v1392_v57 = vadd.f32 %v2679_v7, %v3713_v53  ;;  %v2682_v62 = vadd.f32 %v2681_v44, %v2680_v43  ;;  %v1508_v22 = vpack.c.bf16 %v1487_v63, %v1486_v25 }
 0x535   :  { %v1456_v16 = vadd.f32 %v3769_v15, %v1392_v57  ;;  %v1395_v21 = vadd.f32 %v2682_v62, %v3715_v5  ;;  %1743 = vmatmul.mubr.bf16.gmra.mrb[168].mxu0 %v1508_v22 }
 0x536   :  { %1752 = vmatprep.mubr.bf16.mxu0 %v4305_v18 }
 0x537   :  { %v1457_v30 = vadd.f32 %v3769_v15, %v1395_v21  ;;  %v2683_v14 = vpop.f32.mrb[112].mxu1  ;;  %v1488_v11 = vmax.f32 %v1456_v16, 0.0 }
 0x538   :  { %v2684_v37 = vpop.f32.mrb[113].mxu1 }
 0x539   :  { %v1489_v32 = vmax.f32 %v1457_v30, 0.0  ;;  %v2685_v45 = vadd.f32 %v2684_v37, %v2683_v14  ;;  %v2686_v38 = vpop.f32.mrb[114].mxu1 }
 0x53a   :  { %v2687_v33 = vpop.f32.mrb[115].mxu1 }
 0x53b   :  { %v1400_v53 = vadd.f32 %v2685_v45, %v3717_v24  ;;  %v2688_v41 = vadd.f32 %v2687_v33, %v2686_v38  ;;  %v1509_v56 = vpack.c.bf16 %v1489_v32, %v1488_v11 }
 0x53d   :  { %v1458_v46 = vadd.f32 %v3769_v15, %v1400_v53  ;;  %v1403_v5 = vadd.f32 %v2688_v41, %v3719_v61  ;;  %1753 = vmatmul.mubr.bf16.gmra.mrb[172].mxu0 %v1509_v56 }
 0x53e   :  { %1762 = vmatprep.mubr.bf16.mxu0 %v4305_v18 }
 0x53f   :  { %v1459_v51 = vadd.f32 %v3769_v15, %v1403_v5  ;;  %v2689_v13 = vpop.f32.mrb[116].mxu1  ;;  %v1490_v40 = vmax.f32 %v1458_v46, 0.0 }
 0x540   :  { %v2690_v55 = vpop.f32.mrb[117].mxu1 }
 0x541   :  { %v1491_v60 = vmax.f32 %v1459_v51, 0.0  ;;  %v2691_v6 = vadd.f32 %v2690_v55, %v2689_v13  ;;  %v2692_v1 = vpop.f32.mrb[118].mxu1 }
 0x542   :  { %v2693_v54 = vpop.f32.mrb[119].mxu1 }
 0x543   :  { %v1408_v24 = vadd.f32 %v2691_v6, %v3721_v2  ;;  %v2694_v4 = vadd.f32 %v2693_v54, %v2692_v1  ;;  %v1510_v49 = vpack.c.bf16 %v1491_v60, %v1490_v40 }
 0x545   :  { %v1460_v23 = vadd.f32 %v3769_v15, %v1408_v24  ;;  %v1411_v61 = vadd.f32 %v2694_v4, %v3723_v47  ;;  %1763 = vmatmul.mubr.bf16.gmra.mrb[176].mxu0 %v1510_v49 }
 0x546   :  { %1772 = vmatprep.mubr.bf16.mxu0 %v4305_v18 }
 0x547   :  { %v1461_v26 = vadd.f32 %v3769_v15, %v1411_v61  ;;  %v2695_v8 = vpop.f32.mrb[120].mxu1  ;;  %v1492_v9 = vmax.f32 %v1460_v23, 0.0 }
 0x548   :  { %v2696_v50 = vpop.f32.mrb[121].mxu1 }
 0x549   :  { %v1493_v28 = vmax.f32 %v1461_v26, 0.0  ;;  %v2697_v29 = vadd.f32 %v2696_v50, %v2695_v8  ;;  %v2698_v58 = vpop.f32.mrb[122].mxu1 }
 0x54a   :  { %v2699_v19 = vpop.f32.mrb[123].mxu1 }
 0x54b   :  { %v1416_v2 = vadd.f32 %v2697_v29, %v3725_v17  ;;  %v2700_v31 = vadd.f32 %v2699_v19, %v2698_v58  ;;  %v1511_v34 = vpack.c.bf16 %v1493_v28, %v1492_v9 }
 0x54d   :  { %v1462_v0 = vadd.f32 %v3769_v15, %v1416_v2  ;;  %v1419_v47 = vadd.f32 %v2700_v31, %v3727_v12  ;;  %1773 = vmatmul.mubr.bf16.gmra.mrb[180].mxu0 %v1511_v34 }
 0x54e   :  { %1782 = vmatprep.mubr.bf16.mxu0 %v4305_v18 }
 0x54f   :  { %v1463_v52 = vadd.f32 %v3769_v15, %v1419_v47  ;;  %v2701_v36 = vpop.f32.mrb[124].mxu1  ;;  %v1494_v39 = vmax.f32 %v1462_v0, 0.0 }
 0x550   :  { %v2702_v35 = vpop.f32.mrb[125].mxu1 }
 0x551   :  { %v1495_v27 = vmax.f32 %v1463_v52, 0.0  ;;  %v2703_v42 = vadd.f32 %v2702_v35, %v2701_v36  ;;  %v2704_v59 = vpop.f32.mrb[126].mxu1 }
 0x552   :  { %v2705_v10 = vpop.f32.mrb[127].mxu1 }
 0x553   :  { %v1424_v17 = vadd.f32 %v2703_v42, %v3729_v20  ;;  %v2706_v25 = vadd.f32 %v2705_v10, %v2704_v59  ;;  %v1512_v63 = vpack.c.bf16 %v1495_v27, %v1494_v39 }
 0x555   :  { %v1464_v7 = vadd.f32 %v3769_v15, %v1424_v17  ;;  %v1427_v12 = vadd.f32 %v2706_v25, %v3731_v3  ;;  %1783 = vmatmul.mubr.bf16.gmra.mrb[184].mxu0 %v1512_v63 }
 0x556   :  { %1792 = vmatprep.mubr.bf16.mxu0 %v4305_v18 }
 0x557   :  { %v1465_v43 = vadd.f32 %v3769_v15, %v1427_v12  ;;  %v1496_v44 = vmax.f32 %v1464_v7, 0.0 }
 0x559   :  { %v1497_v57 = vmax.f32 %v1465_v43, 0.0 }
 0x55b   :  { %v1513_v62 = vpack.c.bf16 %v1497_v57, %v1496_v44 }
 0x55d   :  { %1793 = vmatmul.mubr.bf16.gmra.mrb[188].mxu0 %v1513_v62 }
 0x5b8   :  { %v1644_v22 = vpop.f32.mrb[128].mxu0 }
 0x5b9   :  { %v3850_v16 = vpop.f32.mrb[129].mxu0 }
 0x5ba   :  { %v1648_v21 = vpop.f32.mrb[130].mxu0 }
 0x5bb   :  { %v1803_v20 = vpack.c.bf16 %v1648_v21, %v1644_v22  ;;  %v3852_v30 = vpop.f32.mrb[131].mxu0 }
 0x5c0   :  { %v1654_v14 = vpop.f32.mrb[132].mxu0 }
 0x5c1   :  { %v3854_v37 = vpop.f32.mrb[133].mxu0 }
 0x5c2   :  { %v1658_v3 = vpop.f32.mrb[134].mxu0 }
 0x5c3   :  { %v1804_v11 = vpack.c.bf16 %v1658_v3, %v1654_v14  ;;  %v3856_v32 = vpop.f32.mrb[135].mxu0 }
 0x5c8   :  { %v1664_v18 = vpop.f32.mrb[136].mxu0 }
 0x5c9   :  { %v3858_v15 = vpop.f32.mrb[137].mxu0 }
 0x5ca   :  { %v1668_v45 = vpop.f32.mrb[138].mxu0 }
 0x5cb   :  { %v1805_v38 = vpack.c.bf16 %v1668_v45, %v1664_v18  ;;  %v3860_v33 = vpop.f32.mrb[139].mxu0 }
 0x5d0   :  { %v1674_v53 = vpop.f32.mrb[140].mxu0 }
 0x5d1   :  { %v3862_v41 = vpop.f32.mrb[141].mxu0 }
 0x5d2   :  { %v1678_v56 = vpop.f32.mrb[142].mxu0 }
 0x5d3   :  { %v1806_v46 = vpack.c.bf16 %v1678_v56, %v1674_v53  ;;  %v3864_v5 = vpop.f32.mrb[143].mxu0 }
 0x5d8   :  { %v1684_v51 = vpop.f32.mrb[144].mxu0 }
 0x5d9   :  { %v3866_v13 = vpop.f32.mrb[145].mxu0 }
 0x5da   :  { %v1688_v55 = vpop.f32.mrb[146].mxu0 }
 0x5db   :  { %v1807_v40 = vpack.c.bf16 %v1688_v55, %v1684_v51  ;;  %v3868_v60 = vpop.f32.mrb[147].mxu0 }
 0x5e0   :  { %v1694_v6 = vpop.f32.mrb[148].mxu0 }
 0x5e1   :  { %v3870_v1 = vpop.f32.mrb[149].mxu0 }
 0x5e2   :  { %v1698_v54 = vpop.f32.mrb[150].mxu0 }
 0x5e3   :  { %v1808_v24 = vpack.c.bf16 %v1698_v54, %v1694_v6  ;;  %v3872_v4 = vpop.f32.mrb[151].mxu0 }
 0x5e8   :  { %v1704_v49 = vpop.f32.mrb[152].mxu0 }
 0x5e9   :  { %v3874_v23 = vpop.f32.mrb[153].mxu0 }
 0x5ea   :  { %v1708_v61 = vpop.f32.mrb[154].mxu0 }
 0x5eb   :  { %v1809_v26 = vpack.c.bf16 %v1708_v61, %v1704_v49  ;;  %v3876_v8 = vpop.f32.mrb[155].mxu0  ;;  %v3095_v49 = vld [vmem:[#allocation2] ss:$8 sps:$4 sm:$0xff]   ;;  %v3097_v61 = vld [vmem:[#allocation2 + $0x10] ss:$8 sps:$4 sm:$0xff]  }
 0x5f0   :  { %v1714_v50 = vpop.f32.mrb[156].mxu0 }
 0x5f1   :  { %v3878_v9 = vpop.f32.mrb[157].mxu0 }
 0x5f2   :  { %v1718_v28 = vpop.f32.mrb[158].mxu0 }
 0x5f3   :  { %v1810_v29 = vpack.c.bf16 %v1718_v28, %v1714_v50  ;;  %v3880_v58 = vpop.f32.mrb[159].mxu0  ;;  %v3098_v50 = vld [vmem:[#allocation2 + $0x24] ss:$8 sps:$4 sm:$0xff]   ;;  %v3099_v28 = vld [vmem:[#allocation2 + $0x20] ss:$8 sps:$4 sm:$0xff]  }
 0x5f8   :  { %v1724_v19 = vpop.f32.mrb[160].mxu0 }
 0x5f9   :  { %v3882_v2 = vpop.f32.mrb[161].mxu0 }
 0x5fa   :  { %v1728_v31 = vpop.f32.mrb[162].mxu0 }
 0x5fb   :  { %v1811_v34 = vpack.c.bf16 %v1728_v31, %v1724_v19  ;;  %v3884_v0 = vpop.f32.mrb[163].mxu0  ;;  %v3101_v19 = vld [vmem:[#allocation2 + $0x30] ss:$8 sps:$4 sm:$0xff]   ;;  %v3102_v31 = vld [vmem:[#allocation2 + $0x44] ss:$8 sps:$4 sm:$0xff]  }
 0x5fd   :  { %2707 = vmatprep.subr.bf16.mxu1 %v1811_v34  ;;  %v3103_v34 = vld [vmem:[#allocation2 + $0x40] ss:$8 sps:$4 sm:$0xff]  }
 0x5fe   :  { %2708 = vmatpush3.bf16.msra.mxu1 %v1803_v20 }
 0x600   :  { %v1734_v47 = vpop.f32.mrb[164].mxu0 }
 0x601   :  { %v3886_v52 = vpop.f32.mrb[165].mxu0 }
 0x602   :  { %v1738_v36 = vpop.f32.mrb[166].mxu0 }
 0x603   :  { %v1812_v35 = vpack.c.bf16 %v1738_v36, %v1734_v47  ;;  %v3888_v39 = vpop.f32.mrb[167].mxu0  ;;  %v3104_v47 = vld [vmem:[#allocation2 + $0x54] ss:$8 sps:$4 sm:$0xff]   ;;  %v3106_v36 = vld [vmem:[#allocation2 + $0x64] ss:$8 sps:$4 sm:$0xff]  }
 0x605   :  { %2709 = vmatprep.subr.bf16.mxu1 %v1812_v35  ;;  %v3107_v35 = vld [vmem:[#allocation2 + $0x60] ss:$8 sps:$4 sm:$0xff]  }
 0x606   :  { %2710 = vmatpush3.bf16.msra.mxu1 %v1804_v11 }
 0x608   :  { %v1744_v27 = vpop.f32.mrb[168].mxu0 }
 0x609   :  { %v3890_v42 = vpop.f32.mrb[169].mxu0 }
 0x60a   :  { %v1748_v59 = vpop.f32.mrb[170].mxu0 }
 0x60b   :  { %v1813_v10 = vpack.c.bf16 %v1748_v59, %v1744_v27  ;;  %v3892_v17 = vpop.f32.mrb[171].mxu0  ;;  %v3108_v27 = vld [vmem:[#allocation2 + $0x74] ss:$8 sps:$4 sm:$0xff]   ;;  %v3109_v59 = vld [vmem:[#allocation2 + $0x70] ss:$8 sps:$4 sm:$0xff]  }
 0x60d   :  { %2711 = vmatprep.subr.bf16.mxu1 %v1813_v10  ;;  %v3110_v10 = vld [vmem:[#allocation2 + $0x84] ss:$8 sps:$4 sm:$0xff]  }
 0x60e   :  { %2712 = vmatpush3.bf16.msra.mxu1 %v1805_v38 }
 0x610   :  { %v1754_v25 = vpop.f32.mrb[172].mxu0 }
 0x611   :  { %v3894_v63 = vpop.f32.mrb[173].mxu0 }
 0x612   :  { %v1758_v7 = vpop.f32.mrb[174].mxu0 }
 0x613   :  { %v1814_v12 = vpack.c.bf16 %v1758_v7, %v1754_v25  ;;  %v3896_v43 = vpop.f32.mrb[175].mxu0  ;;  %v3111_v25 = vld [vmem:[#allocation2 + $0x80] ss:$8 sps:$4 sm:$0xff]   ;;  %v3112_v7 = vld [vmem:[#allocation2 + $0x94] ss:$8 sps:$4 sm:$0xff]  }
 0x615   :  { %2713 = vmatprep.subr.bf16.mxu1 %v1814_v12  ;;  %v3113_v12 = vld [vmem:[#allocation2 + $0x90] ss:$8 sps:$4 sm:$0xff]  }
 0x616   :  { %2714 = vmatpush3.bf16.msra.mxu1 %v1806_v46 }
 0x618   :  { %v1764_v44 = vpop.f32.mrb[176].mxu0 }
 0x619   :  { %v3898_v57 = vpop.f32.mrb[177].mxu0 }
 0x61a   :  { %v1768_v62 = vpop.f32.mrb[178].mxu0 }
 0x61b   :  { %v1815_v22 = vpack.c.bf16 %v1768_v62, %v1764_v44  ;;  %v3900_v21 = vpop.f32.mrb[179].mxu0  ;;  %v3114_v44 = vld [vmem:[#allocation2 + $0xa4] ss:$8 sps:$4 sm:$0xff]   ;;  %v3115_v62 = vld [vmem:[#allocation2 + $0xa0] ss:$8 sps:$4 sm:$0xff]  }
 0x61d   :  { %2715 = vmatprep.subr.bf16.mxu1 %v1815_v22  ;;  %v3116_v22 = vld [vmem:[#allocation2 + $0xb4] ss:$8 sps:$4 sm:$0xff]  }
 0x61e   :  { %2716 = vmatpush3.bf16.msra.mxu1 %v1807_v40 }
 0x620   :  { %v1774_v20 = vpop.f32.mrb[180].mxu0 }
 0x621   :  { %v3902_v14 = vpop.f32.mrb[181].mxu0 }
 0x622   :  { %v1778_v3 = vpop.f32.mrb[182].mxu0 }
 0x623   :  { %v1816_v11 = vpack.c.bf16 %v1778_v3, %v1774_v20  ;;  %v3904_v18 = vpop.f32.mrb[183].mxu0  ;;  %v3117_v20 = vld [vmem:[#allocation2 + $0xb0] ss:$8 sps:$4 sm:$0xff]   ;;  %v3118_v3 = vld [vmem:[#allocation2 + $0xc4] ss:$8 sps:$4 sm:$0xff]  }
 0x625   :  { %2717 = vmatprep.subr.bf16.mxu1 %v1816_v11  ;;  %v3119_v11 = vld [vmem:[#allocation2 + $0xc0] ss:$8 sps:$4 sm:$0xff]  }
 0x626   :  { %2718 = vmatpush3.bf16.msra.mxu1 %v1808_v24  ;;  %v3096_v24 = vld [vmem:[#allocation2 + $0x14] ss:$8 sps:$4 sm:$0xff]  }
 0x628   :  { %v1784_v45 = vpop.f32.mrb[184].mxu0 }
 0x629   :  { %v3906_v38 = vpop.f32.mrb[185].mxu0 }
 0x62a   :  { %v1788_v53 = vpop.f32.mrb[186].mxu0 }
 0x62b   :  { %v1817_v56 = vpack.c.bf16 %v1788_v53, %v1784_v45  ;;  %v3908_v46 = vpop.f32.mrb[187].mxu0  ;;  %v3120_v45 = vld [vmem:[#allocation2 + $0xd4] ss:$8 sps:$4 sm:$0xff]   ;;  %v3121_v53 = vld [vmem:[#allocation2 + $0xd0] ss:$8 sps:$4 sm:$0xff]  }
 0x62d   :  { %2719 = vmatprep.subr.bf16.mxu1 %v1817_v56  ;;  %v3122_v56 = vld [vmem:[#allocation2 + $0xe4] ss:$8 sps:$4 sm:$0xff]  }
 0x62e   :  { %2720 = vmatpush3.bf16.msra.mxu1 %v1809_v26  ;;  %v3100_v26 = vld [vmem:[#allocation2 + $0x34] ss:$8 sps:$4 sm:$0xff]  }
 0x630   :  { %v1794_v51 = vpop.f32.mrb[188].mxu0 }
 0x631   :  { %v3910_v55 = vpop.f32.mrb[189].mxu0 }
 0x632   :  { %v1798_v40 = vpop.f32.mrb[190].mxu0 }
 0x633   :  { %v1818_v6 = vpack.c.bf16 %v1798_v40, %v1794_v51  ;;  %v3912_v54 = vpop.f32.mrb[191].mxu0  ;;  %v3123_v51 = vld [vmem:[#allocation2 + $0xe0] ss:$8 sps:$4 sm:$0xff]   ;;  %v3124_v40 = vld [vmem:[#allocation2 + $0xf4] ss:$8 sps:$4 sm:$0xff]  }
 0x635   :  { %2721 = vmatprep.subr.bf16.mxu1 %v1818_v6  ;;  %v3125_v6 = vld [vmem:[#allocation2 + $0xf0] ss:$8 sps:$4 sm:$0xff]  }
 0x636   :  { %2722 = vmatpush3.bf16.msra.mxu1 %v1810_v29  ;;  %v3105_v29 = vld [vmem:[#allocation2 + $0x50] ss:$8 sps:$4 sm:$0xff]  }
 0x639   :  { %1852 = vmatmul.mubr.bf16.vlgmr.msra.gmra.mrb[128].mxu1 %v3095_v49  ;;  %v1982_v49 = vsub.s32 2, %v4324_v48 }
 0x63a   :  { %1859 = vmatprep.mubr.bf16.mxu1 %v3096_v24 }
 0x641   :  { %1860 = vmatmul.mubr.bf16.gmra.mrb[132].mxu1 %v3097_v61 }
 0x642   :  { %1867 = vmatprep.mubr.bf16.mxu1 %v3098_v50 }
 0x649   :  { %1868 = vmatmul.mubr.bf16.gmra.mrb[136].mxu1 %v3099_v28 }
 0x64a   :  { %1875 = vmatprep.mubr.bf16.mxu1 %v3100_v26  ;;  %v3126_v26 = vld [vmem:[%s4260_s5] sm:$0x7]  ;;  %s3277_s5 = smov [#allocation11]  }
 0x64b   :  { %s2373_s12 = sshll.u32 %s3277_s5, 4  ;;  %s2374_s12 = int_to_ptr.vmem [resolvable:$true] %s2373_s12 }
 0x64c   :  { %s3237_s13 = scalar_lea.vmem %s2374_s12, 4096  ;;  %p3242_p13 = scmp.lt.s32.totalorder %s2374_s12, %s2374_s12 }
 0x64d   :  { %p3238_p12 = scmp.ne.s32.totalorder %s2374_s12, %s3237_s13  ;;  %p3243_p0 = scmp.lt.s32.totalorder %s3237_s13, %s3237_s13 }
 0x64f   :  { %p3244_p1 = por %p3243_p0, %p3242_p13 }
 0x651   :  { %1876 = vmatmul.mubr.bf16.gmra.mrb[140].mxu1 %v3101_v19  ;;  %v3918_v19 = vrot.slane %v3126_v26, %v1982_v49  ;;  %p3245_p2 = pnand %p3244_p1, %p3238_p12 }
 0x652   :  { %1883 = vmatprep.mubr.bf16.mxu1 %v3102_v31 }
 0x659   :  { %1884 = vmatmul.mubr.bf16.gmra.mrb[144].mxu1 %v3103_v34 }
 0x65a   :  { %1891 = vmatprep.mubr.bf16.mxu1 %v3104_v47 }
 0x661   :  { %1892 = vmatmul.mubr.bf16.gmra.mrb[148].mxu1 %v3105_v29 }
 0x662   :  { %1899 = vmatprep.mubr.bf16.mxu1 %v3106_v36 }
 0x669   :  { %1900 = vmatmul.mubr.bf16.gmra.mrb[152].mxu1 %v3107_v35 }
 0x66a   :  { %1907 = vmatprep.mubr.bf16.mxu1 %v3108_v27 }
 0x671   :  { %1908 = vmatmul.mubr.bf16.gmra.mrb[156].mxu1 %v3109_v59 }
 0x672   :  { %1915 = vmatprep.mubr.bf16.mxu1 %v3110_v10 }
 0x679   :  { %1916 = vmatmul.mubr.bf16.gmra.mrb[160].mxu1 %v3111_v25 }
 0x67a   :  { %1923 = vmatprep.mubr.bf16.mxu1 %v3112_v7 }
 0x681   :  { %1924 = vmatmul.mubr.bf16.gmra.mrb[164].mxu1 %v3113_v12 }
 0x682   :  { %1931 = vmatprep.mubr.bf16.mxu1 %v3114_v44 }
 0x689   :  { %1932 = vmatmul.mubr.bf16.gmra.mrb[168].mxu1 %v3115_v62 }
 0x68a   :  { %1939 = vmatprep.mubr.bf16.mxu1 %v3116_v22 }
 0x691   :  { %1940 = vmatmul.mubr.bf16.gmra.mrb[172].mxu1 %v3117_v20 }
 0x692   :  { %1947 = vmatprep.mubr.bf16.mxu1 %v3118_v3 }
 0x699   :  { %1948 = vmatmul.mubr.bf16.gmra.mrb[176].mxu1 %v3119_v11 }
 0x69a   :  { %1955 = vmatprep.mubr.bf16.mxu1 %v3120_v45 }
 0x6a1   :  { %1956 = vmatmul.mubr.bf16.gmra.mrb[180].mxu1 %v3121_v53 }
 0x6a2   :  { %1963 = vmatprep.mubr.bf16.mxu1 %v3122_v56 }
 0x6a9   :  { %1964 = vmatmul.mubr.bf16.gmra.mrb[184].mxu1 %v3123_v51 }
 0x6aa   :  { %1971 = vmatprep.mubr.bf16.mxu1 %v3124_v40 }
 0x6b1   :  { %1972 = vmatmul.mubr.bf16.gmra.mrb[188].mxu1 %v3125_v6 }
 0x70c   :  { %v2723_v24 = vpop.f32.mrb[128].mxu1 }
 0x70d   :  { %v2724_v61 = vpop.f32.mrb[129].mxu1 }
 0x70e   :  { %v2725_v50 = vadd.f32 %v2724_v61, %v2723_v24  ;;  %v2726_v28 = vpop.f32.mrb[130].mxu1 }
 0x70f   :  { %v2727_v31 = vpop.f32.mrb[131].mxu1 }
 0x710   :  { %v1854_v34 = vadd.f32 %v2725_v50, %v3850_v16  ;;  %v2728_v47 = vadd.f32 %v2727_v31, %v2726_v28 }
 0x712   :  { %v1857_v29 = vadd.f32 %v2728_v47, %v3852_v30  ;;  %v3923_v36 = vadd.f32 %v3918_v19, %v1854_v34 }
 0x714   :  { %v2729_v48 = vpop.f32.mrb[132].mxu1  ;;  %2016 = vmax.xlane.f32.xlu0 %v3923_v36  ;;  %v3927_v10 = vadd.f32 %v3918_v19, %v1857_v29 }
 0x715   :  { %v2730_v35 = vpop.f32.mrb[133].mxu1 }
 0x716   :  { %v2731_v27 = vadd.f32 %v2730_v35, %v2729_v48  ;;  %v2732_v59 = vpop.f32.mrb[134].mxu1 }
 0x717   :  { %v2733_v25 = vpop.f32.mrb[135].mxu1 }
 0x718   :  { %v1862_v7 = vadd.f32 %v2731_v27, %v3854_v37  ;;  %v2734_v12 = vadd.f32 %v2733_v25, %v2732_v59  ;;  %2018 = vmax.xlane.f32.xlu0 %v3927_v10 }
 0x71a   :  { %v1865_v16 = vadd.f32 %v2734_v12, %v3856_v32  ;;  %v3933_v30 = vadd.f32 %v3918_v19, %v1862_v7 }
 0x71c   :  { %v2735_v44 = vpop.f32.mrb[136].mxu1  ;;  %2020 = vmax.xlane.f32.xlu1 %v3933_v30  ;;  %v3937_v3 = vadd.f32 %v3918_v19, %v1865_v16 }
 0x71d   :  { %v2736_v62 = vpop.f32.mrb[137].mxu1 }
 0x71e   :  { %v2737_v22 = vadd.f32 %v2736_v62, %v2735_v44  ;;  %v2738_v20 = vpop.f32.mrb[138].mxu1 }
 0x71f   :  { %v2739_v11 = vpop.f32.mrb[139].mxu1 }
 0x720   :  { %v1870_v37 = vadd.f32 %v2737_v22, %v3858_v15  ;;  %v2740_v45 = vadd.f32 %v2739_v11, %v2738_v20  ;;  %2022 = vmax.xlane.f32.xlu1 %v3937_v3 }
 0x722   :  { %v1873_v32 = vadd.f32 %v2740_v45, %v3860_v33  ;;  %v3943_v53 = vadd.f32 %v3918_v19, %v1870_v37 }
 0x724   :  { %v2741_v56 = vpop.f32.mrb[140].mxu1  ;;  %2024 = vmax.xlane.f32.xlu0 %v3943_v53  ;;  %v3947_v51 = vadd.f32 %v3918_v19, %v1873_v32 }
 0x725   :  { %v2742_v40 = vpop.f32.mrb[141].mxu1 }
 0x726   :  { %v2743_v6 = vadd.f32 %v2742_v40, %v2741_v56  ;;  %v2744_v49 = vpop.f32.mrb[142].mxu1  ;;  %2026 = vmax.xlane.f32.xlu1 %v3947_v51 }
 0x727   :  { %v2745_v15 = vpop.f32.mrb[143].mxu1 }
 0x728   :  { %v1878_v24 = vadd.f32 %v2743_v6, %v3862_v41  ;;  %v2746_v61 = vadd.f32 %v2745_v15, %v2744_v49 }
 0x72a   :  { %v1881_v33 = vadd.f32 %v2746_v61, %v3864_v5  ;;  %v3953_v50 = vadd.f32 %v3918_v19, %v1878_v24 }
 0x72c   :  { %v2747_v28 = vpop.f32.mrb[144].mxu1  ;;  %2028 = vmax.xlane.f32.xlu0 %v3953_v50  ;;  %v3957_v26 = vadd.f32 %v3918_v19, %v1881_v33 }
 0x72d   :  { %v2748_v31 = vpop.f32.mrb[145].mxu1 }
 0x72e   :  { %v2749_v34 = vadd.f32 %v2748_v31, %v2747_v28  ;;  %v2750_v47 = vpop.f32.mrb[146].mxu1  ;;  %2030 = vmax.xlane.f32.xlu1 %v3957_v26 }
 0x72f   :  { %v2751_v29 = vpop.f32.mrb[147].mxu1 }
 0x730   :  { %v1886_v41 = vadd.f32 %v2749_v34, %v3866_v13  ;;  %v2752_v48 = vadd.f32 %v2751_v29, %v2750_v47 }
 0x732   :  { %v1889_v5 = vadd.f32 %v2752_v48, %v3868_v60  ;;  %v3963_v35 = vadd.f32 %v3918_v19, %v1886_v41 }
 0x734   :  { %v2753_v27 = vpop.f32.mrb[148].mxu1  ;;  %2032 = vmax.xlane.f32.xlu0 %v3963_v35  ;;  %v3967_v59 = vadd.f32 %v3918_v19, %v1889_v5 }
 0x735   :  { %v2754_v25 = vpop.f32.mrb[149].mxu1 }
 0x736   :  { %v2755_v7 = vadd.f32 %v2754_v25, %v2753_v27  ;;  %v2756_v12 = vpop.f32.mrb[150].mxu1  ;;  %2034 = vmax.xlane.f32.xlu1 %v3967_v59 }
 0x737   :  { %v2757_v16 = vpop.f32.mrb[151].mxu1 }
 0x738   :  { %v1894_v13 = vadd.f32 %v2755_v7, %v3870_v1  ;;  %v2758_v44 = vadd.f32 %v2757_v16, %v2756_v12 }
 0x73a   :  { %v1897_v60 = vadd.f32 %v2758_v44, %v3872_v4  ;;  %v3973_v62 = vadd.f32 %v3918_v19, %v1894_v13 }
 0x73c   :  { %v2759_v22 = vpop.f32.mrb[152].mxu1  ;;  %2036 = vmax.xlane.f32.xlu0 %v3973_v62  ;;  %v3977_v20 = vadd.f32 %v3918_v19, %v1897_v60 }
 0x73d   :  { %v2760_v11 = vpop.f32.mrb[153].mxu1 }
 0x73e   :  { %v2761_v37 = vadd.f32 %v2760_v11, %v2759_v22  ;;  %v2762_v45 = vpop.f32.mrb[154].mxu1  ;;  %2038 = vmax.xlane.f32.xlu1 %v3977_v20 }
 0x73f   :  { %v2763_v32 = vpop.f32.mrb[155].mxu1 }
 0x740   :  { %v1902_v1 = vadd.f32 %v2761_v37, %v3874_v23  ;;  %v2764_v56 = vadd.f32 %v2763_v32, %v2762_v45 }
 0x742   :  { %v1905_v4 = vadd.f32 %v2764_v56, %v3876_v8  ;;  %v3983_v40 = vadd.f32 %v3918_v19, %v1902_v1 }
 0x744   :  { %v2765_v6 = vpop.f32.mrb[156].mxu1  ;;  %2040 = vmax.xlane.f32.xlu0 %v3983_v40  ;;  %v3987_v49 = vadd.f32 %v3918_v19, %v1905_v4 }
 0x745   :  { %v2766_v15 = vpop.f32.mrb[157].mxu1 }
 0x746   :  { %v2767_v24 = vadd.f32 %v2766_v15, %v2765_v6  ;;  %v2768_v61 = vpop.f32.mrb[158].mxu1  ;;  %2042 = vmax.xlane.f32.xlu1 %v3987_v49 }
 0x747   :  { %v2769_v33 = vpop.f32.mrb[159].mxu1 }
 0x748   :  { %v1910_v23 = vadd.f32 %v2767_v24, %v3878_v9  ;;  %v2770_v28 = vadd.f32 %v2769_v33, %v2768_v61 }
 0x74a   :  { %v1913_v8 = vadd.f32 %v2770_v28, %v3880_v58  ;;  %v3993_v31 = vadd.f32 %v3918_v19, %v1910_v23 }
 0x74c   :  { %v2771_v34 = vpop.f32.mrb[160].mxu1  ;;  %2044 = vmax.xlane.f32.xlu0 %v3993_v31  ;;  %v3997_v47 = vadd.f32 %v3918_v19, %v1913_v8 }
 0x74d   :  { %v2772_v29 = vpop.f32.mrb[161].mxu1 }
 0x74e   :  { %v2773_v41 = vadd.f32 %v2772_v29, %v2771_v34  ;;  %v2774_v48 = vpop.f32.mrb[162].mxu1  ;;  %2046 = vmax.xlane.f32.xlu1 %v3997_v47 }
 0x74f   :  { %v2775_v5 = vpop.f32.mrb[163].mxu1 }
 0x750   :  { %v1918_v9 = vadd.f32 %v2773_v41, %v3882_v2  ;;  %v2776_v27 = vadd.f32 %v2775_v5, %v2774_v48 }
 0x752   :  { %v1921_v58 = vadd.f32 %v2776_v27, %v3884_v0  ;;  %v4003_v25 = vadd.f32 %v3918_v19, %v1918_v9 }
 0x754   :  { %v2777_v7 = vpop.f32.mrb[164].mxu1  ;;  %2048 = vmax.xlane.f32.xlu0 %v4003_v25  ;;  %v4007_v12 = vadd.f32 %v3918_v19, %v1921_v58 }
 0x755   :  { %v2778_v16 = vpop.f32.mrb[165].mxu1 }
 0x756   :  { %v2779_v13 = vadd.f32 %v2778_v16, %v2777_v7  ;;  %v2780_v44 = vpop.f32.mrb[166].mxu1  ;;  %2050 = vmax.xlane.f32.xlu1 %v4007_v12 }
 0x757   :  { %v2781_v60 = vpop.f32.mrb[167].mxu1 }
 0x758   :  { %v1926_v2 = vadd.f32 %v2779_v13, %v3886_v52  ;;  %v2782_v22 = vadd.f32 %v2781_v60, %v2780_v44 }
 0x75a   :  { %v1929_v0 = vadd.f32 %v2782_v22, %v3888_v39  ;;  %v4013_v11 = vadd.f32 %v3918_v19, %v1926_v2 }
 0x75c   :  { %v2783_v37 = vpop.f32.mrb[168].mxu1  ;;  %2052 = vmax.xlane.f32.xlu0 %v4013_v11  ;;  %v4017_v45 = vadd.f32 %v3918_v19, %v1929_v0 }
 0x75d   :  { %v2784_v32 = vpop.f32.mrb[169].mxu1 }
 0x75e   :  { %v2785_v1 = vadd.f32 %v2784_v32, %v2783_v37  ;;  %v2786_v56 = vpop.f32.mrb[170].mxu1  ;;  %2054 = vmax.xlane.f32.xlu1 %v4017_v45 }
 0x75f   :  { %v2787_v4 = vpop.f32.mrb[171].mxu1 }
 0x760   :  { %v1934_v52 = vadd.f32 %v2785_v1, %v3890_v42  ;;  %v2788_v6 = vadd.f32 %v2787_v4, %v2786_v56 }
 0x762   :  { %v1937_v39 = vadd.f32 %v2788_v6, %v3892_v17  ;;  %v4023_v15 = vadd.f32 %v3918_v19, %v1934_v52 }
 0x764   :  { %v2789_v24 = vpop.f32.mrb[172].mxu1  ;;  %2056 = vmax.xlane.f32.xlu0 %v4023_v15  ;;  %v4027_v61 = vadd.f32 %v3918_v19, %v1937_v39 }
 0x765   :  { %v2790_v33 = vpop.f32.mrb[173].mxu1 }
 0x766   :  { %v2791_v23 = vadd.f32 %v2790_v33, %v2789_v24  ;;  %v2792_v28 = vpop.f32.mrb[174].mxu1  ;;  %2058 = vmax.xlane.f32.xlu1 %v4027_v61 }
 0x767   :  { %v2793_v8 = vpop.f32.mrb[175].mxu1 }
 0x768   :  { %v1942_v42 = vadd.f32 %v2791_v23, %v3894_v63  ;;  %v2794_v34 = vadd.f32 %v2793_v8, %v2792_v28 }
 0x76a   :  { %v1945_v17 = vadd.f32 %v2794_v34, %v3896_v43  ;;  %v4033_v29 = vadd.f32 %v3918_v19, %v1942_v42 }
 0x76c   :  { %v2795_v41 = vpop.f32.mrb[176].mxu1  ;;  %2060 = vmax.xlane.f32.xlu0 %v4033_v29  ;;  %v4037_v48 = vadd.f32 %v3918_v19, %v1945_v17 }
 0x76d   :  { %v2796_v5 = vpop.f32.mrb[177].mxu1 }
 0x76e   :  { %v2797_v9 = vadd.f32 %v2796_v5, %v2795_v41  ;;  %v2798_v27 = vpop.f32.mrb[178].mxu1  ;;  %2062 = vmax.xlane.f32.xlu1 %v4037_v48 }
 0x76f   :  { %v2799_v58 = vpop.f32.mrb[179].mxu1 }
 0x770   :  { %v1950_v63 = vadd.f32 %v2797_v9, %v3898_v57  ;;  %v2800_v7 = vadd.f32 %v2799_v58, %v2798_v27 }
 0x772   :  { %v1953_v43 = vadd.f32 %v2800_v7, %v3900_v21  ;;  %v4043_v16 = vadd.f32 %v3918_v19, %v1950_v63 }
 0x774   :  { %v2801_v13 = vpop.f32.mrb[180].mxu1  ;;  %2064 = vmax.xlane.f32.xlu0 %v4043_v16  ;;  %v4047_v44 = vadd.f32 %v3918_v19, %v1953_v43 }
 0x775   :  { %v2802_v60 = vpop.f32.mrb[181].mxu1 }
 0x776   :  { %v2803_v2 = vadd.f32 %v2802_v60, %v2801_v13  ;;  %v2804_v22 = vpop.f32.mrb[182].mxu1  ;;  %2066 = vmax.xlane.f32.xlu1 %v4047_v44 }
 0x777   :  { %v2805_v0 = vpop.f32.mrb[183].mxu1 }
 0x778   :  { %v1958_v57 = vadd.f32 %v2803_v2, %v3902_v14  ;;  %v2806_v37 = vadd.f32 %v2805_v0, %v2804_v22 }
 0x77a   :  { %v1961_v21 = vadd.f32 %v2806_v37, %v3904_v18  ;;  %v4053_v32 = vadd.f32 %v3918_v19, %v1958_v57 }
 0x77c   :  { %v2807_v1 = vpop.f32.mrb[184].mxu1  ;;  %2068 = vmax.xlane.f32.xlu0 %v4053_v32  ;;  %v4057_v56 = vadd.f32 %v3918_v19, %v1961_v21 }
 0x77d   :  { %v2808_v4 = vpop.f32.mrb[185].mxu1 }
 0x77e   :  { %v2809_v52 = vadd.f32 %v2808_v4, %v2807_v1  ;;  %v2810_v6 = vpop.f32.mrb[186].mxu1  ;;  %2070 = vmax.xlane.f32.xlu1 %v4057_v56 }
 0x77f   :  { %v2811_v39 = vpop.f32.mrb[187].mxu1 }
 0x780   :  { %v1966_v14 = vadd.f32 %v2809_v52, %v3906_v38  ;;  %v2812_v24 = vadd.f32 %v2811_v39, %v2810_v6 }
 0x782   :  { %v1969_v18 = vadd.f32 %v2812_v24, %v3908_v46  ;;  %v4063_v33 = vadd.f32 %v3918_v19, %v1966_v14 }
 0x784   :  { %v2813_v23 = vpop.f32.mrb[188].mxu1  ;;  %2072 = vmax.xlane.f32.xlu0 %v4063_v33  ;;  %v4067_v28 = vadd.f32 %v3918_v19, %v1969_v18 }
 0x785   :  { %v2814_v8 = vpop.f32.mrb[189].mxu1 }
 0x786   :  { %v2815_v42 = vadd.f32 %v2814_v8, %v2813_v23  ;;  %v2816_v34 = vpop.f32.mrb[190].mxu1  ;;  %2074 = vmax.xlane.f32.xlu1 %v4067_v28 }
 0x787   :  { %v2817_v17 = vpop.f32.mrb[191].mxu1 }
 0x788   :  { %v1974_v38 = vadd.f32 %v2815_v42, %v3910_v55  ;;  %v2818_v41 = vadd.f32 %v2817_v17, %v2816_v34 }
 0x78a   :  { %v1977_v46 = vadd.f32 %v2818_v41, %v3912_v54  ;;  %v4073_v5 = vadd.f32 %v3918_v19, %v1974_v38 }
 0x78c   :  { %2076 = vmax.xlane.f32.xlu0 %v4073_v5  ;;  %v4077_v9 = vadd.f32 %v3918_v19, %v1977_v46 }
 0x78e   :  { %2078 = vmax.xlane.f32.xlu1 %v4077_v9 }
 0x7a1   :  { %v2017_v27 = vpop.xlane.xlu0 %2016 }
 0x7a2   :  { %v4081_v58 = vsub.f32 %v3923_v36, %v2017_v27 }
 0x7a4   :  { %v2112_v63 = vmul.f32 1.442695, %v4081_v58 }
 0x7a5   :  { %v2019_v55 = vpop.xlane.xlu0 %2018 }
 0x7a6   :  { %2966 = vpow2.f32 %v2112_v63  ;;  %v4085_v54 = vsub.f32 %v3927_v10, %v2019_v55 }
 0x7a8   :  { %v2114_v7 = vmul.f32 1.442695, %v4085_v54 }
 0x7a9   :  { %v2021_v43 = vpop.xlane.xlu1 %2020 }
 0x7aa   :  { %2968 = vpow2.f32 %v2114_v7  ;;  %v4089_v19 = vsub.f32 %v3933_v30, %v2021_v43 }
 0x7ac   :  { %v2116_v13 = vmul.f32 1.442695, %v4089_v19 }
 0x7ad   :  { %v2023_v60 = vpop.xlane.xlu1 %2022 }
 0x7ae   :  { %2970 = vpow2.f32 %v2116_v13  ;;  %v4093_v36 = vsub.f32 %v3937_v3, %v2023_v60 }
 0x7b0   :  { %v2967_v2 = vpop.eup %2966  ;;  %v2118_v22 = vmul.f32 1.442695, %v4093_v36 }
 0x7b1   :  { %2176 = vadd.xlane.f32.xlu0 %v2967_v2  ;;  %v2025_v10 = vpop.xlane.xlu0 %2024 }
 0x7b2   :  { %2972 = vpow2.f32 %v2118_v22  ;;  %v4097_v0 = vsub.f32 %v3943_v53, %v2025_v10 }
 0x7b3   :  { %v2027_v57 = vpop.xlane.xlu1 %2026 }
 0x7b4   :  { %v2969_v37 = vpop.eup %2968  ;;  %v2120_v30 = vmul.f32 1.442695, %v4097_v0  ;;  %v4101_v21 = vsub.f32 %v3947_v51, %v2027_v57 }
 0x7b5   :  { %2178 = vadd.xlane.f32.xlu1 %v2969_v37 }
 0x7b6   :  { %2974 = vpow2.f32 %v2120_v30  ;;  %v2122_v3 = vmul.f32 1.442695, %v4101_v21 }
 0x7b8   :  { %v2971_v1 = vpop.eup %2970  ;;  %2976 = vpow2.f32 %v2122_v3 }
 0x7b9   :  { %2180 = vadd.xlane.f32.xlu0 %v2971_v1  ;;  %v2029_v4 = vpop.xlane.xlu0 %2028 }
 0x7ba   :  { %v4105_v52 = vsub.f32 %v3953_v50, %v2029_v4 }
 0x7bb   :  { %v2031_v53 = vpop.xlane.xlu1 %2030 }
 0x7bc   :  { %v2973_v6 = vpop.eup %2972  ;;  %v2124_v39 = vmul.f32 1.442695, %v4105_v52  ;;  %v4109_v14 = vsub.f32 %v3957_v26, %v2031_v53 }
 0x7bd   :  { %2182 = vadd.xlane.f32.xlu1 %v2973_v6 }
 0x7be   :  { %2978 = vpow2.f32 %v2124_v39  ;;  %v2126_v51 = vmul.f32 1.442695, %v4109_v14 }
 0x7c0   :  { %v2975_v24 = vpop.eup %2974  ;;  %2980 = vpow2.f32 %v2126_v51 }
 0x7c1   :  { %2184 = vadd.xlane.f32.xlu0 %v2975_v24  ;;  %v2033_v18 = vpop.xlane.xlu0 %2032 }
 0x7c2   :  { %v2977_v23 = vpop.eup %2976  ;;  %v4113_v8 = vsub.f32 %v3963_v35, %v2033_v18 }
 0x7c3   :  { %v2035_v50 = vpop.xlane.xlu1 %2034  ;;  %2186 = vadd.xlane.f32.xlu1 %v2977_v23 }
 0x7c4   :  { %v2128_v42 = vmul.f32 1.442695, %v4113_v8  ;;  %v4117_v34 = vsub.f32 %v3967_v59, %v2035_v50 }
 0x7c6   :  { %2982 = vpow2.f32 %v2128_v42  ;;  %v2130_v26 = vmul.f32 1.442695, %v4117_v34 }
 0x7c8   :  { %v2979_v17 = vpop.eup %2978  ;;  %2984 = vpow2.f32 %v2130_v26 }
 0x7c9   :  { %2188 = vadd.xlane.f32.xlu0 %v2979_v17  ;;  %v2037_v38 = vpop.xlane.xlu0 %2036 }
 0x7ca   :  { %v2981_v41 = vpop.eup %2980  ;;  %v4121_v46 = vsub.f32 %v3973_v62, %v2037_v38 }
 0x7cb   :  { %v2039_v35 = vpop.xlane.xlu1 %2038  ;;  %2190 = vadd.xlane.f32.xlu1 %v2981_v41 }
 0x7cc   :  { %v2132_v27 = vmul.f32 1.442695, %v4121_v46  ;;  %v4125_v63 = vsub.f32 %v3977_v20, %v2039_v35 }
 0x7ce   :  { %2986 = vpow2.f32 %v2132_v27  ;;  %v2134_v59 = vmul.f32 1.442695, %v4125_v63 }
 0x7d0   :  { %v2983_v55 = vpop.eup %2982  ;;  %2988 = vpow2.f32 %v2134_v59 }
 0x7d1   :  { %2192 = vadd.xlane.f32.xlu0 %v2983_v55  ;;  %v2041_v7 = vpop.xlane.xlu0 %2040 }
 0x7d2   :  { %v2985_v43 = vpop.eup %2984  ;;  %v4129_v13 = vsub.f32 %v3983_v40, %v2041_v7 }
 0x7d3   :  { %v2043_v62 = vpop.xlane.xlu1 %2042  ;;  %2194 = vadd.xlane.f32.xlu1 %v2985_v43 }
 0x7d4   :  { %v2136_v60 = vmul.f32 1.442695, %v4129_v13  ;;  %v4133_v2 = vsub.f32 %v3987_v49, %v2043_v62 }
 0x7d6   :  { %2990 = vpow2.f32 %v2136_v60  ;;  %v2138_v20 = vmul.f32 1.442695, %v4133_v2 }
 0x7d8   :  { %v2987_v22 = vpop.eup %2986  ;;  %2992 = vpow2.f32 %v2138_v20 }
 0x7d9   :  { %2196 = vadd.xlane.f32.xlu0 %v2987_v22  ;;  %v2045_v10 = vpop.xlane.xlu0 %2044 }
 0x7da   :  { %v2989_v57 = vpop.eup %2988  ;;  %v4137_v37 = vsub.f32 %v3993_v31, %v2045_v10 }
 0x7db   :  { %v2047_v40 = vpop.xlane.xlu1 %2046  ;;  %2198 = vadd.xlane.f32.xlu1 %v2989_v57 }
 0x7dc   :  { %v2140_v30 = vmul.f32 1.442695, %v4137_v37  ;;  %v4141_v3 = vsub.f32 %v3997_v47, %v2047_v40 }
 0x7de   :  { %2994 = vpow2.f32 %v2140_v30  ;;  %v2142_v49 = vmul.f32 1.442695, %v4141_v3 }
 0x7e0   :  { %v2991_v1 = vpop.eup %2990  ;;  %2996 = vpow2.f32 %v2142_v49 }
 0x7e1   :  { %2200 = vadd.xlane.f32.xlu0 %v2991_v1  ;;  %v2049_v4 = vpop.xlane.xlu0 %2048 }
 0x7e2   :  { %v2993_v53 = vpop.eup %2992  ;;  %v4145_v6 = vsub.f32 %v4003_v25, %v2049_v4 }
 0x7e3   :  { %v2051_v31 = vpop.xlane.xlu1 %2050  ;;  %2202 = vadd.xlane.f32.xlu1 %v2993_v53 }
 0x7e4   :  { %v2144_v39 = vmul.f32 1.442695, %v4145_v6  ;;  %v4149_v51 = vsub.f32 %v4007_v12, %v2051_v31 }
 0x7e6   :  { %2998 = vpow2.f32 %v2144_v39  ;;  %v2146_v47 = vmul.f32 1.442695, %v4149_v51 }
 0x7e8   :  { %v2995_v24 = vpop.eup %2994  ;;  %3000 = vpow2.f32 %v2146_v47 }
 0x7e9   :  { %2204 = vadd.xlane.f32.xlu0 %v2995_v24  ;;  %v2053_v18 = vpop.xlane.xlu0 %2052 }
 0x7ea   :  { %v2997_v23 = vpop.eup %2996  ;;  %v4153_v50 = vsub.f32 %v4013_v11, %v2053_v18 }
 0x7eb   :  { %v2055_v25 = vpop.xlane.xlu1 %2054  ;;  %2206 = vadd.xlane.f32.xlu1 %v2997_v23 }
 0x7ec   :  { %v2148_v42 = vmul.f32 1.442695, %v4153_v50  ;;  %v4157_v26 = vsub.f32 %v4017_v45, %v2055_v25 }
 0x7ee   :  { %3002 = vpow2.f32 %v2148_v42  ;;  %v2150_v12 = vmul.f32 1.442695, %v4157_v26 }
 0x7f0   :  { %v2999_v17 = vpop.eup %2998  ;;  %3004 = vpow2.f32 %v2150_v12 }
 0x7f1   :  { %2208 = vadd.xlane.f32.xlu0 %v2999_v17  ;;  %v2057_v38 = vpop.xlane.xlu0 %2056 }
 0x7f2   :  { %v3001_v41 = vpop.eup %3000  ;;  %v4161_v35 = vsub.f32 %v4023_v15, %v2057_v38 }
 0x7f3   :  { %v2059_v11 = vpop.xlane.xlu1 %2058  ;;  %2210 = vadd.xlane.f32.xlu1 %v3001_v41 }
 0x7f4   :  { %v2152_v27 = vmul.f32 1.442695, %v4161_v35  ;;  %v4165_v59 = vsub.f32 %v4027_v61, %v2059_v11 }
 0x7f6   :  { %3006 = vpow2.f32 %v2152_v27  ;;  %v2154_v45 = vmul.f32 1.442695, %v4165_v59 }
 0x7f8   :  { %v3003_v55 = vpop.eup %3002  ;;  %3008 = vpow2.f32 %v2154_v45 }
 0x7f9   :  { %2212 = vadd.xlane.f32.xlu0 %v3003_v55  ;;  %v2061_v7 = vpop.xlane.xlu0 %2060 }
 0x7fa   :  { %v3005_v43 = vpop.eup %3004  ;;  %v4169_v62 = vsub.f32 %v4033_v29, %v2061_v7 }
 0x7fb   :  { %v2063_v15 = vpop.xlane.xlu1 %2062  ;;  %2214 = vadd.xlane.f32.xlu1 %v3005_v43 }
 0x7fc   :  { %v2156_v60 = vmul.f32 1.442695, %v4169_v62  ;;  %v4173_v20 = vsub.f32 %v4037_v48, %v2063_v15 }
 0x7fe   :  { %3010 = vpow2.f32 %v2156_v60  ;;  %v2158_v61 = vmul.f32 1.442695, %v4173_v20 }
 0x800   :  { %v3007_v22 = vpop.eup %3006  ;;  %3012 = vpow2.f32 %v2158_v61 }
 0x801   :  { %2216 = vadd.xlane.f32.xlu0 %v3007_v22  ;;  %v2065_v10 = vpop.xlane.xlu0 %2064 }
 0x802   :  { %v3009_v57 = vpop.eup %3008  ;;  %v4177_v40 = vsub.f32 %v4043_v16, %v2065_v10 }
 0x803   :  { %v2067_v29 = vpop.xlane.xlu1 %2066  ;;  %2218 = vadd.xlane.f32.xlu1 %v3009_v57 }
 0x804   :  { %v2160_v30 = vmul.f32 1.442695, %v4177_v40  ;;  %v4181_v49 = vsub.f32 %v4047_v44, %v2067_v29 }
 0x806   :  { %3014 = vpow2.f32 %v2160_v30  ;;  %v2162_v48 = vmul.f32 1.442695, %v4181_v49 }
 0x808   :  { %v3011_v1 = vpop.eup %3010  ;;  %3016 = vpow2.f32 %v2162_v48 }
 0x809   :  { %2220 = vadd.xlane.f32.xlu0 %v3011_v1  ;;  %v2069_v4 = vpop.xlane.xlu0 %2068 }
 0x80a   :  { %v3013_v53 = vpop.eup %3012  ;;  %v4185_v31 = vsub.f32 %v4053_v32, %v2069_v4 }
 0x80b   :  { %v2071_v16 = vpop.xlane.xlu1 %2070  ;;  %2222 = vadd.xlane.f32.xlu1 %v3013_v53 }
 0x80c   :  { %v2164_v39 = vmul.f32 1.442695, %v4185_v31  ;;  %v4189_v47 = vsub.f32 %v4057_v56, %v2071_v16 }
 0x80e   :  { %3018 = vpow2.f32 %v2164_v39  ;;  %v2166_v44 = vmul.f32 1.442695, %v4189_v47 }
 0x810   :  { %v3015_v24 = vpop.eup %3014  ;;  %3020 = vpow2.f32 %v2166_v44 }
 0x811   :  { %2224 = vadd.xlane.f32.xlu0 %v3015_v24  ;;  %v2073_v18 = vpop.xlane.xlu0 %2072 }
 0x812   :  { %v3017_v23 = vpop.eup %3016  ;;  %v4193_v25 = vsub.f32 %v4063_v33, %v2073_v18 }
 0x813   :  { %v2075_v32 = vpop.xlane.xlu1 %2074  ;;  %2226 = vadd.xlane.f32.xlu1 %v3017_v23 }
 0x814   :  { %v2168_v42 = vmul.f32 1.442695, %v4193_v25  ;;  %v4197_v12 = vsub.f32 %v4067_v28, %v2075_v32 }
 0x816   :  { %3022 = vpow2.f32 %v2168_v42  ;;  %v2170_v56 = vmul.f32 1.442695, %v4197_v12 }
 0x818   :  { %v3019_v17 = vpop.eup %3018  ;;  %3024 = vpow2.f32 %v2170_v56 }
 0x819   :  { %2228 = vadd.xlane.f32.xlu0 %v3019_v17  ;;  %v2077_v38 = vpop.xlane.xlu0 %2076 }
 0x81a   :  { %v3021_v41 = vpop.eup %3020  ;;  %v4201_v11 = vsub.f32 %v4073_v5, %v2077_v38 }
 0x81b   :  { %2230 = vadd.xlane.f32.xlu1 %v3021_v41  ;;  %v2079_v33 = vpop.xlane.xlu1 %2078 }
 0x81c   :  { %v2172_v27 = vmul.f32 1.442695, %v4201_v11  ;;  %v4205_v45 = vsub.f32 %v4077_v9, %v2079_v33 }
 0x81e   :  { %3026 = vpow2.f32 %v2172_v27  ;;  %v2174_v28 = vmul.f32 1.442695, %v4205_v45 }
 0x820   :  { %v3023_v55 = vpop.eup %3022  ;;  %3028 = vpow2.f32 %v2174_v28 }
 0x821   :  { %2232 = vadd.xlane.f32.xlu0 %v3023_v55 }
 0x822   :  { %v3025_v7 = vpop.eup %3024 }
 0x823   :  { %2234 = vadd.xlane.f32.xlu1 %v3025_v7 }
 0x828   :  { %v3027_v43 = vpop.eup %3026 }
 0x829   :  { %2236 = vadd.xlane.f32.xlu0 %v3027_v43 }
 0x82a   :  { %v3029_v15 = vpop.eup %3028 }
 0x82b   :  { %2238 = vadd.xlane.f32.xlu1 %v3029_v15 }
 0x83e   :  { %v2177_v5 = vpop.xlane.xlu0 %2176 }
 0x83f   :  { %3030 = vlog2.f32 %v2177_v5 }
 0x842   :  { %v2179_v60 = vpop.xlane.xlu1 %2178 }
 0x843   :  { %3032 = vlog2.f32 %v2179_v60 }
 0x846   :  { %v2181_v61 = vpop.xlane.xlu0 %2180 }
 0x847   :  { %3034 = vlog2.f32 %v2181_v61 }
 0x849   :  { %v3031_v9 = vpop.eup %3030 }
 0x84a   :  { %v2241_v22 = vmul.f32 0.6931472, %v3031_v9  ;;  %v2183_v10 = vpop.xlane.xlu1 %2182 }
 0x84b   :  { %3036 = vlog2.f32 %v2183_v10 }
 0x84c   :  { %v2304_v57 = vsub.f32 %v4081_v58, %v2241_v22 }
 0x84d   :  { %v3033_v29 = vpop.eup %3032 }
 0x84e   :  { %2336 = vst [vmem:[#allocation11] sm:$0xff] %v2304_v57  ;;  %v2243_v30 = vmul.f32 0.6931472, %v3033_v29  ;;  %v2185_v48 = vpop.xlane.xlu0 %2184 }
 0x84f   :  { %3038 = vlog2.f32 %v2185_v48 }
 0x850   :  { %v2305_v1 = vsub.f32 %v4085_v54, %v2243_v30  ;;  %v2187_v4 = vpop.xlane.xlu1 %2186 }
 0x851   :  { %v3035_v53 = vpop.eup %3034  ;;  %3040 = vlog2.f32 %v2187_v4 }
 0x852   :  { %2337 = vst [vmem:[#allocation11 + $0x8] sm:$0xff] %v2305_v1  ;;  %v2245_v16 = vmul.f32 0.6931472, %v3035_v53 }
 0x854   :  { %v2306_v39 = vsub.f32 %v4089_v19, %v2245_v16 }
 0x855   :  { %v3037_v44 = vpop.eup %3036 }
 0x856   :  { %2338 = vst [vmem:[#allocation11 + $0x10] sm:$0xff] %v2306_v39  ;;  %v2247_v24 = vmul.f32 0.6931472, %v3037_v44  ;;  %v2189_v18 = vpop.xlane.xlu0 %2188 }
 0x857   :  { %3042 = vlog2.f32 %v2189_v18 }
 0x858   :  { %v2307_v58 = vsub.f32 %v4093_v36, %v2247_v24  ;;  %v2191_v23 = vpop.xlane.xlu1 %2190 }
 0x859   :  { %v3039_v32 = vpop.eup %3038  ;;  %3044 = vlog2.f32 %v2191_v23 }
 0x85a   :  { %2339 = vst [vmem:[#allocation11 + $0x18] sm:$0xff] %v2307_v58  ;;  %v2249_v42 = vmul.f32 0.6931472, %v3039_v32 }
 0x85b   :  { %v3041_v54 = vpop.eup %3040 }
 0x85c   :  { %v2308_v56 = vsub.f32 %v4097_v0, %v2249_v42  ;;  %v2251_v17 = vmul.f32 0.6931472, %v3041_v54 }
 0x85e   :  { %2340 = vst [vmem:[#allocation11 + $0x20] sm:$0xff] %v2308_v56  ;;  %v2309_v38 = vsub.f32 %v4101_v21, %v2251_v17  ;;  %v2193_v19 = vpop.xlane.xlu0 %2192 }
 0x85f   :  { %3046 = vlog2.f32 %v2193_v19 }
 0x860   :  { %2341 = vst [vmem:[#allocation11 + $0x28] sm:$0xff] %v2309_v38  ;;  %v2195_v41 = vpop.xlane.xlu1 %2194 }
 0x861   :  { %v3043_v33 = vpop.eup %3042  ;;  %3048 = vlog2.f32 %v2195_v41 }
 0x862   :  { %v2253_v27 = vmul.f32 0.6931472, %v3043_v33 }
 0x863   :  { %v3045_v36 = vpop.eup %3044 }
 0x864   :  { %v2310_v28 = vsub.f32 %v4105_v52, %v2253_v27  ;;  %v2255_v55 = vmul.f32 0.6931472, %v3045_v36 }
 0x866   :  { %2342 = vst [vmem:[#allocation11 + $0x30] sm:$0xff] %v2310_v28  ;;  %v2311_v7 = vsub.f32 %v4109_v14, %v2255_v55  ;;  %v2197_v43 = vpop.xlane.xlu0 %2196 }
 0x867   :  { %3050 = vlog2.f32 %v2197_v43 }
 0x868   :  { %2343 = vst [vmem:[#allocation11 + $0x38] sm:$0xff] %v2311_v7  ;;  %v2199_v0 = vpop.xlane.xlu1 %2198 }
 0x869   :  { %v3047_v15 = vpop.eup %3046  ;;  %3052 = vlog2.f32 %v2199_v0 }
 0x86a   :  { %v2257_v21 = vmul.f32 0.6931472, %v3047_v15 }
 0x86b   :  { %v3049_v5 = vpop.eup %3048 }
 0x86c   :  { %v2312_v60 = vsub.f32 %v4113_v8, %v2257_v21  ;;  %v2259_v61 = vmul.f32 0.6931472, %v3049_v5 }
 0x86e   :  { %2344 = vst [vmem:[#allocation11 + $0x40] sm:$0xff] %v2312_v60  ;;  %v2313_v9 = vsub.f32 %v4117_v34, %v2259_v61  ;;  %v2201_v22 = vpop.xlane.xlu0 %2200 }
 0x86f   :  { %3054 = vlog2.f32 %v2201_v22 }
 0x870   :  { %2345 = vst [vmem:[#allocation11 + $0x48] sm:$0xff] %v2313_v9  ;;  %v2203_v52 = vpop.xlane.xlu1 %2202 }
 0x871   :  { %v3051_v10 = vpop.eup %3050  ;;  %3056 = vlog2.f32 %v2203_v52 }
 0x872   :  { %v2261_v14 = vmul.f32 0.6931472, %v3051_v10 }
 0x873   :  { %v3053_v57 = vpop.eup %3052 }
 0x874   :  { %v2314_v29 = vsub.f32 %v4121_v46, %v2261_v14  ;;  %v2263_v30 = vmul.f32 0.6931472, %v3053_v57 }
 0x876   :  { %2346 = vst [vmem:[#allocation11 + $0x50] sm:$0xff] %v2314_v29  ;;  %v2315_v48 = vsub.f32 %v4125_v63, %v2263_v30  ;;  %v2205_v1 = vpop.xlane.xlu0 %2204 }
 0x877   :  { %3058 = vlog2.f32 %v2205_v1 }
 0x878   :  { %2347 = vst [vmem:[#allocation11 + $0x58] sm:$0xff] %v2315_v48  ;;  %v2207_v8 = vpop.xlane.xlu1 %2206 }
 0x879   :  { %v3055_v4 = vpop.eup %3054  ;;  %3060 = vlog2.f32 %v2207_v8 }
 0x87a   :  { %v2265_v34 = vmul.f32 0.6931472, %v3055_v4 }
 0x87b   :  { %v3057_v53 = vpop.eup %3056 }
 0x87c   :  { %v2316_v16 = vsub.f32 %v4129_v13, %v2265_v34  ;;  %v2267_v39 = vmul.f32 0.6931472, %v3057_v53 }
 0x87e   :  { %2348 = vst [vmem:[#allocation11 + $0x60] sm:$0xff] %v2316_v16  ;;  %v2317_v44 = vsub.f32 %v4133_v2, %v2267_v39  ;;  %v2209_v24 = vpop.xlane.xlu0 %2208 }
 0x87f   :  { %3062 = vlog2.f32 %v2209_v24 }
 0x880   :  { %2349 = vst [vmem:[#allocation11 + $0x68] sm:$0xff] %v2317_v44  ;;  %v2211_v46 = vpop.xlane.xlu1 %2210 }
 0x881   :  { %v3059_v18 = vpop.eup %3058  ;;  %3064 = vlog2.f32 %v2211_v46 }
 0x882   :  { %v2269_v63 = vmul.f32 0.6931472, %v3059_v18 }
 0x883   :  { %v3061_v58 = vpop.eup %3060 }
 0x884   :  { %v2318_v23 = vsub.f32 %v4137_v37, %v2269_v63  ;;  %v2271_v32 = vmul.f32 0.6931472, %v3061_v58 }
 0x886   :  { %2350 = vst [vmem:[#allocation11 + $0x70] sm:$0xff] %v2318_v23  ;;  %v2319_v42 = vsub.f32 %v4141_v3, %v2271_v32  ;;  %v2213_v54 = vpop.xlane.xlu0 %2212 }
 0x887   :  { %3066 = vlog2.f32 %v2213_v54 }
 0x888   :  { %2351 = vst [vmem:[#allocation11 + $0x78] sm:$0xff] %v2319_v42  ;;  %v2215_v13 = vpop.xlane.xlu1 %2214 }
 0x889   :  { %v3063_v56 = vpop.eup %3062  ;;  %3068 = vlog2.f32 %v2215_v13 }
 0x88a   :  { %v2273_v2 = vmul.f32 0.6931472, %v3063_v56 }
 0x88b   :  { %v3065_v17 = vpop.eup %3064 }
 0x88c   :  { %v2320_v38 = vsub.f32 %v4145_v6, %v2273_v2  ;;  %v2275_v19 = vmul.f32 0.6931472, %v3065_v17 }
 0x88e   :  { %2352 = vst [vmem:[#allocation11 + $0x80] sm:$0xff] %v2320_v38  ;;  %v2321_v41 = vsub.f32 %v4149_v51, %v2275_v19  ;;  %v2217_v33 = vpop.xlane.xlu0 %2216 }
 0x88f   :  { %3070 = vlog2.f32 %v2217_v33 }
 0x890   :  { %2353 = vst [vmem:[#allocation11 + $0x88] sm:$0xff] %v2321_v41  ;;  %v2219_v37 = vpop.xlane.xlu1 %2218 }
 0x891   :  { %v3067_v27 = vpop.eup %3066  ;;  %3072 = vlog2.f32 %v2219_v37 }
 0x892   :  { %v2277_v3 = vmul.f32 0.6931472, %v3067_v27 }
 0x893   :  { %v3069_v36 = vpop.eup %3068 }
 0x894   :  { %v2322_v28 = vsub.f32 %v4153_v50, %v2277_v3  ;;  %v2279_v55 = vmul.f32 0.6931472, %v3069_v36 }
 0x896   :  { %2354 = vst [vmem:[#allocation11 + $0x90] sm:$0xff] %v2322_v28  ;;  %v2323_v7 = vsub.f32 %v4157_v26, %v2279_v55  ;;  %v2221_v43 = vpop.xlane.xlu0 %2220 }
 0x897   :  { %3074 = vlog2.f32 %v2221_v43 }
 0x898   :  { %2355 = vst [vmem:[#allocation11 + $0x98] sm:$0xff] %v2323_v7  ;;  %v2223_v6 = vpop.xlane.xlu1 %2222 }
 0x899   :  { %v3071_v0 = vpop.eup %3070  ;;  %3076 = vlog2.f32 %v2223_v6 }
 0x89a   :  { %v2281_v51 = vmul.f32 0.6931472, %v3071_v0 }
 0x89b   :  { %v3073_v15 = vpop.eup %3072 }
 0x89c   :  { %v2324_v21 = vsub.f32 %v4161_v35, %v2281_v51  ;;  %v2283_v5 = vmul.f32 0.6931472, %v3073_v15 }
 0x89e   :  { %2356 = vst [vmem:[#allocation11 + $0xa0] sm:$0xff] %v2324_v21  ;;  %v2325_v60 = vsub.f32 %v4165_v59, %v2283_v5  ;;  %v2225_v61 = vpop.xlane.xlu0 %2224 }
 0x89f   :  { %3078 = vlog2.f32 %v2225_v61 }
 0x8a0   :  { %2357 = vst [vmem:[#allocation11 + $0xa8] sm:$0xff] %v2325_v60  ;;  %v2227_v50 = vpop.xlane.xlu1 %2226 }
 0x8a1   :  { %v3075_v9 = vpop.eup %3074  ;;  %3080 = vlog2.f32 %v2227_v50 }
 0x8a2   :  { %v2285_v26 = vmul.f32 0.6931472, %v3075_v9 }
 0x8a3   :  { %v3077_v22 = vpop.eup %3076 }
 0x8a4   :  { %v2326_v52 = vsub.f32 %v4169_v62, %v2285_v26  ;;  %v2287_v10 = vmul.f32 0.6931472, %v3077_v22 }
 0x8a6   :  { %2358 = vst [vmem:[#allocation11 + $0xb0] sm:$0xff] %v2326_v52  ;;  %v2327_v14 = vsub.f32 %v4173_v20, %v2287_v10  ;;  %v2229_v57 = vpop.xlane.xlu0 %2228 }
 0x8a7   :  { %3082 = vlog2.f32 %v2229_v57 }
 0x8a8   :  { %2359 = vst [vmem:[#allocation11 + $0xb8] sm:$0xff] %v2327_v14  ;;  %v2231_v35 = vpop.xlane.xlu1 %2230 }
 0x8a9   :  { %v3079_v29 = vpop.eup %3078  ;;  %3084 = vlog2.f32 %v2231_v35 }
 0x8aa   :  { %v2289_v59 = vmul.f32 0.6931472, %v3079_v29 }
 0x8ab   :  { %v3081_v30 = vpop.eup %3080 }
 0x8ac   :  { %v2328_v48 = vsub.f32 %v4177_v40, %v2289_v59  ;;  %v2291_v1 = vmul.f32 0.6931472, %v3081_v30 }
 0x8ae   :  { %2360 = vst [vmem:[#allocation11 + $0xc0] sm:$0xff] %v2328_v48  ;;  %v2329_v8 = vsub.f32 %v4181_v49, %v2291_v1  ;;  %v2233_v4 = vpop.xlane.xlu0 %2232 }
 0x8af   :  { %3086 = vlog2.f32 %v2233_v4 }
 0x8b0   :  { %2361 = vst [vmem:[#allocation11 + $0xc8] sm:$0xff] %v2329_v8  ;;  %v2235_v62 = vpop.xlane.xlu1 %2234 }
 0x8b1   :  { %v3083_v34 = vpop.eup %3082  ;;  %3088 = vlog2.f32 %v2235_v62 }
 0x8b2   :  { %v2293_v20 = vmul.f32 0.6931472, %v3083_v34 }
 0x8b3   :  { %v3085_v53 = vpop.eup %3084 }
 0x8b4   :  { %v2330_v16 = vsub.f32 %v4185_v31, %v2293_v20  ;;  %v2295_v39 = vmul.f32 0.6931472, %v3085_v53 }
 0x8b6   :  { %2362 = vst [vmem:[#allocation11 + $0xd0] sm:$0xff] %v2330_v16  ;;  %v2331_v44 = vsub.f32 %v4189_v47, %v2295_v39  ;;  %v2237_v24 = vpop.xlane.xlu0 %2236 }
 0x8b7   :  { %3090 = vlog2.f32 %v2237_v24 }
 0x8b8   :  { %2363 = vst [vmem:[#allocation11 + $0xd8] sm:$0xff] %v2331_v44  ;;  %v2239_v40 = vpop.xlane.xlu1 %2238 }
 0x8b9   :  { %v3087_v46 = vpop.eup %3086  ;;  %3092 = vlog2.f32 %v2239_v40 }
 0x8ba   :  { %v2297_v49 = vmul.f32 0.6931472, %v3087_v46 }
 0x8bb   :  { %v3089_v18 = vpop.eup %3088 }
 0x8bc   :  { %v2332_v63 = vsub.f32 %v4193_v25, %v2297_v49  ;;  %v2299_v58 = vmul.f32 0.6931472, %v3089_v18 }
 0x8be   :  { %2364 = vst [vmem:[#allocation11 + $0xe0] sm:$0xff] %v2332_v63  ;;  %v2333_v23 = vsub.f32 %v4197_v12, %v2299_v58 }
 0x8c0   :  { %2365 = vst [vmem:[#allocation11 + $0xe8] sm:$0xff] %v2333_v23 }
 0x8c1   :  { %v3091_v31 = vpop.eup %3090 }
 0x8c2   :  { %v2301_v32 = vmul.f32 0.6931472, %v3091_v31 }
 0x8c3   :  { %v3093_v42 = vpop.eup %3092 }
 0x8c4   :  { %v2334_v47 = vsub.f32 %v4201_v11, %v2301_v32  ;;  %v2303_v54 = vmul.f32 0.6931472, %v3093_v42 }
 0x8c6   :  { %2366 = vst [vmem:[#allocation11 + $0xf0] sm:$0xff] %v2334_v47  ;;  %v2335_v13 = vsub.f32 %v4205_v45, %v2303_v54 }
 0x8c8   :  { %2367 = vst [vmem:[#allocation11 + $0xf8] sm:$0xff] %v2335_v13 }
 0x8c9   :  { %3248 = shalt.err (!%p3245_p2)
}
 0x8ca   :  { %s3249_s17 = scalar_lea.hbm %s4261_s6, 4096 }
 0x8cb   :  { %p3250_p3 = scmp.ne.s32.totalorder %s4261_s6, %s3249_s17  ;;  %p3253_p4 = scmp.lt.u32.totalorder %s3249_s17, %s4261_s6 }
 0x8cd   :  { %p3255_p5 = pnand %p3253_p4, %p3250_p3 }
 0x8cf   :  { %3258 = shalt.err (!%p3255_p5)
}
 0x8d0   :  { %2379 = dma.vmem_to_hbm [thread:$0]  %s2374_s12, 4096, %s4261_s6, [#allocation4], %s3272_s22, %s3272_s22, %s3273_s23  }
 0x8d1   :  { %3265 = dma.done.wait [#allocation4], 4096  }
 0x8d2   :  { %3266 = vsyncadd [#allocation4], 4294963200 }
 0x8d3   :  { %2383 = vsyncpa [#allocation3], 1 }
 0x8d4   :  { %2384 = vsyncpa [#allocation6], 1 }
 0x8d5   :  { %2385 = vsyncpa [#allocation9], 1 }
 0x8d6   :  { %2386 = vsyncpa [#allocation4], 1 }

</bundles_post_ra>
